<compile_context>
chip_gen: v7x
topology: tpu7x:2x2x1
jax: 0.10.0
libtpu: 0.0.40
codegen_flags: <defaults>
</compile_context>

<pallas_src>
import jax
import jax.numpy as jnp
from jax.experimental import pallas as pl
from jax.experimental.pallas import tpu as pltpu


# --------------------------------------------------------------------------
# Kernel
# --------------------------------------------------------------------------
def _conv3x3_unshuffle_kernel(x_main, x_top, x_bot, w_ref, o_ref, xbuf):
    # x_main: (1, 4, T2, W2, Cin)  parity planes (p*2+q) of the T2-half-row band
    # x_top : (1, 2, 1, W2, Cin)   odd-row  planes (p=1), half-row above band
    # x_bot : (1, 2, 1, W2, Cin)   even-row planes (p=0), half-row below band
    # w_ref : (4*Cout, 16*Cin)     fused conv + pixel-unshuffle weights
    # o_ref : (1, 4*Cout, T2*W2)   pixel-unshuffled output, flattened spatial
    # xbuf  : (4, T2+2, W2+2, Cin) VMEM scratch: padded parity planes
    r = pl.program_id(1)
    nr = pl.num_programs(1)
    T2, W2, Cin = x_main.shape[2], x_main.shape[3], x_main.shape[4]
    dt = xbuf.dtype

    # ---- assemble padded parity planes in VMEM -----------------------------
    xbuf[:, 1:T2 + 1, 1:W2 + 1, :] = x_main[0]

    # Left / right zero columns.  Only (q=1, col 0) (full-res col -1) and
    # (q=0, col W2+1) (full-res col W) are ever read; both must be zero.
    zc = jnp.zeros((4, T2 + 2, 1, Cin), dt)
    xbuf[:, :, 0:1, :] = zc
    xbuf[:, :, W2 + 1:W2 + 2, :] = zc

    # Top halo: odd-row parity planes (indices 2:4), padded row 0
    # (= full-res row r*TH - 1; zero at the image border).
    @pl.when(r == 0)
    def _():
        xbuf[2:4, 0:1, 1:W2 + 1, :] = jnp.zeros((2, 1, W2, Cin), dt)

    @pl.when(r > 0)
    def _():
        xbuf[2:4, 0:1, 1:W2 + 1, :] = x_top[0]

    # Bottom halo: even-row parity planes (indices 0:2), padded row T2+1
    # (= full-res row r*TH + TH; zero at the image border).
    @pl.when(r == nr - 1)
    def _():
        xbuf[0:2, T2 + 1:T2 + 2, 1:W2 + 1, :] = jnp.zeros((2, 1, W2, Cin), dt)

    @pl.when(r < nr - 1)
    def _():
        xbuf[0:2, T2 + 1:T2 + 2, 1:W2 + 1, :] = x_bot[0]

    # ---- im2col over 4x4 input patches at stride 2 -------------------------
    # Tap (dy, dx) of the patch lives on parity plane (p, q) with a contiguous
    # +/-1 shift in half-resolution coordinates -> 16 contiguous slices.
    taps = []
    for dy in range(4):
        p, dh = (dy - 1) % 2, (dy - 1) // 2
        for dx in range(4):
            q, dw = (dx - 1) % 2, (dx - 1) // 2
            taps.append(xbuf[2 * p + q,
                             1 + dh:1 + dh + T2,
                             1 + dw:1 + dw + W2, :])
    a = jnp.concatenate(taps, axis=-1).reshape(T2 * W2, 16 * Cin)

    # ---- single MXU matmul, K = 16*Cin --------------------------------------
    # (4Cout, 16Cin) x (T2*W2, 16Cin)^T -> (4Cout, T2*W2): unshuffled channels
    # on sublanes, flattened half-res spatial on the lane axis (lane-dense).
    y = jax.lax.dot_general(
        w_ref[...], a,
        dimension_numbers=(((1,), (1,)), ((), ())),
        preferred_element_type=jnp.float32,
    )
    o_ref[0] = y.astype(o_ref.dtype)


# --------------------------------------------------------------------------
# Tiling / VMEM policy
# --------------------------------------------------------------------------
def _vmem_limit_bytes():
    try:
        cap = int(pltpu.get_tpu_info().vmem_capacity_bytes)
    except Exception:
        cap = 64 * 1024 * 1024                # conservative (v7x-sized) default
    return min(int(cap * 3 // 4), 96 * 1024 * 1024)


def _pick_tile_rows2(H2, W2, Cin, Cout, itemsize, budget):
    """Largest half-row tile T2 that (a) divides H2, (b) keeps the flattened
    output block lane-aligned (T2*W2 % 128 == 0, or T2 == H2 i.e. full dim)
    and (c) fits a VMEM budget with double-buffered blocks + scratch."""
    cin_p = -(-Cin // 128) * 128              # lane padding of channel-last blocks
    k_p = -(-(16 * Cin) // 128) * 128
    w2_p = -(-W2 // 8) * 8

    def footprint(t2):
        blk_in = 2 * 4 * t2 * w2_p * cin_p * itemsize        # main band, 2 bufs
        blk_halo = 2 * 2 * 2 * 8 * w2_p * cin_p * itemsize   # halo blocks
        blk_out = 2 * 4 * Cout * t2 * W2 * itemsize          # output, 2 bufs
        scratch = 4 * (t2 + 2) * (w2_p + 8) * cin_p * itemsize
        im2col = t2 * W2 * k_p * itemsize
        result = 4 * Cout * t2 * W2 * 4
        return int(1.25 * (blk_in + blk_halo + blk_out + scratch +
                           2 * im2col + result))

    cands = [d for d in range(H2, 0, -1)
             if H2 % d == 0 and ((d * W2) % 128 == 0 or d == H2)]
    for t2 in cands:                          # descending => biggest that fits
        if footprint(t2) <= budget:
            return t2
    return cands[-1]                          # best effort: smallest valid tile


# --------------------------------------------------------------------------
# Wrapper: Downsample_rest forward
# --------------------------------------------------------------------------
def downsample_rest(x_nchw, w_oihw, row_tile2=None):
    """x: (N, n_feat, H, W), w: (n_feat//2, n_feat, 3, 3)
    -> (N, 2*n_feat, H/2, W/2)."""
    N, Cin, H, W = x_nchw.shape
    Cout = w_oihw.shape[0]
    assert H % 2 == 0 and W % 2 == 0, "PixelUnshuffle(2) needs even H, W"
    H2, W2 = H // 2, W // 2

    # De-interleave into 2x2 parity planes, channel-last: (N, 4, H2, W2, Cin),
    # plane index = p*2 + q with p = row parity, q = col parity.
    # TODO(synk): fold this single XLA transpose pass into the kernel.
    xp = jnp.transpose(x_nchw, (0, 2, 3, 1))            # (N, H, W, Cin)
    xp = xp.reshape(N, H2, 2, W2, 2, Cin)
    xp = jnp.transpose(xp, (0, 2, 4, 1, 3, 5)).reshape(N, 4, H2, W2, Cin)

    # Fused conv + PixelUnshuffle weight: (4*Cout, 16*Cin).
    # Row = c*4 + i*2 + j (PixelUnshuffle channel order); column =
    # (dy*4 + dx)*Cin + cin, with the 3x3 kernel placed at patch offset (i, j).
    wk = jnp.transpose(w_oihw, (0, 2, 3, 1))            # (Cout, 3, 3, Cin)
    w4 = jnp.zeros((Cout, 2, 2, 4, 4, Cin), w_oihw.dtype)
    for i in range(2):
        for j in range(2):
            w4 = w4.at[:, i, j, i:i + 3, j:j + 3, :].set(wk)
    w4 = w4.reshape(4 * Cout, 16 * Cin)

    vmem_limit = _vmem_limit_bytes()
    if row_tile2 is None:
        t2 = _pick_tile_rows2(H2, W2, Cin, Cout, x_nchw.dtype.itemsize,
                              int(vmem_limit * 0.8))
    else:
        t2 = int(row_tile2)
        assert H2 % t2 == 0 and ((t2 * W2) % 128 == 0 or t2 == H2)
    grid = (N, H2 // t2)

    y_flat = pl.pallas_call(
        _conv3x3_unshuffle_kernel,
        out_shape=jax.ShapeDtypeStruct((N, 4 * Cout, H2 * W2), x_nchw.dtype),
        grid_spec=pltpu.PrefetchScalarGridSpec(
            num_scalar_prefetch=0,
            grid=grid,
            in_specs=[
                # Main band: all 4 parity planes, T2 half-rows (auto-pipelined).
                pl.BlockSpec((1, 4, t2, W2, Cin),
                             lambda n, r: (n, 0, r, 0, 0)),
                # Top halo: odd-row planes (block 1 of size-2 blocks) at half-row
                # r*T2 - 1, clamped at the image border.
                pl.BlockSpec((1, 2, 1, W2, Cin),
                             lambda n, r: (n, 1, jnp.maximum(r * t2 - 1, 0),
                                           0, 0)),
                # Bottom halo: even-row planes at half-row r*T2 + T2, clamped.
                pl.BlockSpec((1, 2, 1, W2, Cin),
                             lambda n, r: (n, 0,
                                           jnp.minimum(r * t2 + t2, H2 - 1),
                                           0, 0)),
                # Fused weights, resident across the whole grid.
                pl.BlockSpec((4 * Cout, 16 * Cin), lambda n, r: (0, 0)),
            ],
            out_specs=pl.BlockSpec((1, 4 * Cout, t2 * W2),
                                   lambda n, r: (n, 0, r)),
            scratch_shapes=[pltpu.VMEM((4, t2 + 2, W2 + 2, Cin),
                                       x_nchw.dtype)],
        ),
        compiler_params=pltpu.CompilerParams(
            dimension_semantics=("parallel", "parallel"),
            vmem_limit_bytes=vmem_limit,
        ),
    )(xp, xp, xp, w4)

    # Free reshape: channel order is already (c, i, j), spatial is row-major.
    return y_flat.reshape(N, 4 * Cout, H2, W2)


# --------------------------------------------------------------------------
# Reference + test
# --------------------------------------------------------------------------
def pixel_unshuffle_nchw(x, r=2):
    N, C, H, W = x.shape
    x = x.reshape(N, C, H // r, r, W // r, r)           # (n, c, h, i, w, j)
    x = jnp.transpose(x, (0, 1, 3, 5, 2, 4))            # (n, c, i, j, h, w)
    return x.reshape(N, C * r * r, H // r, W // r)


def _reference(x_nchw, w_oihw):
    y = jax.lax.conv_general_dilated(
        x_nchw, w_oihw,
        window_strides=(1, 1), padding=((1, 1), (1, 1)),
        dimension_numbers=("NCHW", "OIHW", "NCHW"),
        precision=jax.lax.Precision.HIGHEST,
    )
    return pixel_unshuffle_nchw(y, r=2)


if __name__ == "__main__":
    key = jax.random.PRNGKey(0)
    kx, kw, kx2 = jax.random.split(key, 3)

    fwd = jax.jit(downsample_rest, static_argnames=("row_tile2",))

    # Case 1: module-sized small input (single row tile).
    N, n_feat, H, W = 2, 4, 16, 16
    x = jax.random.normal(kx, (N, n_feat, H, W), dtype=jnp.float32)
    w = jax.random.normal(kw, (n_feat // 2, n_feat, 3, 3), dtype=jnp.float32) * 0.1

    out = jax.block_until_ready(fwd(x, w))
    ref = _reference(x, w)
    assert out.shape == (N, 2 * n_feat, H // 2, W // 2), out.shape
    assert jnp.allclose(out, ref, atol=2e-4, rtol=2e-4), \
        float(jnp.max(jnp.abs(out - ref)))

    # Case 2: force multiple row tiles so the halo / border path is exercised.
    x2 = jax.random.normal(kx2, (1, n_feat, 32, 32), dtype=jnp.float32)
    out2 = jax.block_until_ready(fwd(x2, w, row_tile2=8))
    ref2 = _reference(x2, w)
    assert jnp.allclose(out2, ref2, atol=2e-4, rtol=2e-4), \
        float(jnp.max(jnp.abs(out2 - ref2)))

    print("KERNEL_OK")
</pallas_src>

<mosaic_0001>
module attributes {stable_mosaic.version = 11 : i64} {
  func.func @_conv3x3_unshuffle_kernel(%arg0: i32, %arg1: i32, %arg2: memref<1x4x8x8x4xf32, #tpu.memory_space<vmem>>, %arg3: memref<1x2x1x8x4xf32, #tpu.memory_space<vmem>>, %arg4: memref<1x2x1x8x4xf32, #tpu.memory_space<vmem>>, %arg5: memref<8x64xf32, #tpu.memory_space<vmem>>, %arg6: memref<1x8x64xf32, #tpu.memory_space<vmem>>, %arg7: memref<4x10x10x4xf32, #tpu.memory_space<vmem>>) attributes {dimension_semantics = [#tpu.dimension_semantics<parallel>, #tpu.dimension_semantics<parallel>], iteration_bounds = array<i64: 2, 1>, scalar_prefetch = 0 : i64, scratch_operands = 1 : i64, tpu.core_type = #tpu.core_type<tc>, window_params = [{transform_indices = @transform_0, window_bounds = array<i64: 1, 4, 8, 8, 4>}, {transform_indices = @transform_1, window_bounds = array<i64: 1, 2, 1, 8, 4>}, {transform_indices = @transform_2, window_bounds = array<i64: 1, 2, 1, 8, 4>}, {pipeline_mode = #tpu.pipeline_mode<synchronous>, transform_indices = @transform_3, window_bounds = array<i64: 8, 64>}, {transform_indices = @transform_4, window_bounds = array<i64: 1, 8, 64>}]} {
    %c0 = arith.constant 0 : index
    %c0_0 = arith.constant 0 : index
    %c0_1 = arith.constant 0 : index
    %c0_2 = arith.constant 0 : index
    %c0_3 = arith.constant 0 : index
    %0 = vector.load %arg2[%c0, %c0_0, %c0_1, %c0_2, %c0_3] : memref<1x4x8x8x4xf32, #tpu.memory_space<vmem>>, vector<1x4x8x8x4xf32>
    %1 = vector.shape_cast %0 : vector<1x4x8x8x4xf32> to vector<4x8x8x4xf32>
    %c0_4 = arith.constant 0 : index
    %c1 = arith.constant 1 : index
    %c1_5 = arith.constant 1 : index
    %c0_6 = arith.constant 0 : index
    %2 = vector.load %arg7[%c0_4, %c1, %c1_5, %c0_6] : memref<4x10x10x4xf32, #tpu.memory_space<vmem>>, vector<4x8x8x4xf32>
    tpu.vector_store %arg7[%c0_4, %c1, %c1_5, %c0_6], %1 {strides = array<i32>} : memref<4x10x10x4xf32, #tpu.memory_space<vmem>>, vector<4x8x8x4xf32>,
    %cst = arith.constant 0.000000e+00 : f32
    %3 = vector.broadcast %cst : f32 to vector<4x10x1x4xf32>
    %c0_7 = arith.constant 0 : index
    %c0_8 = arith.constant 0 : index
    %c0_9 = arith.constant 0 : index
    %c0_10 = arith.constant 0 : index
    %4 = vector.load %arg7[%c0_7, %c0_8, %c0_9, %c0_10] : memref<4x10x10x4xf32, #tpu.memory_space<vmem>>, vector<4x10x1x4xf32>
    tpu.vector_store %arg7[%c0_7, %c0_8, %c0_9, %c0_10], %3 {strides = array<i32>} : memref<4x10x10x4xf32, #tpu.memory_space<vmem>>, vector<4x10x1x4xf32>,
    %c0_11 = arith.constant 0 : index
    %c0_12 = arith.constant 0 : index
    %c9 = arith.constant 9 : index
    %c0_13 = arith.constant 0 : index
    %5 = vector.load %arg7[%c0_11, %c0_12, %c9, %c0_13] : memref<4x10x10x4xf32, #tpu.memory_space<vmem>>, vector<4x10x1x4xf32>
    tpu.vector_store %arg7[%c0_11, %c0_12, %c9, %c0_13], %3 {strides = array<i32>} : memref<4x10x10x4xf32, #tpu.memory_space<vmem>>, vector<4x10x1x4xf32>,
    %c0_i32 = arith.constant 0 : i32
    %6 = arith.cmpi eq, %arg1, %c0_i32 : i32
    %7 = arith.extui %6 : i1 to i32
    %c0_i32_14 = arith.constant 0 : i32
    %8 = arith.cmpi ne, %7, %c0_i32_14 : i32
    scf.if %8 {
      %cst_89 = arith.constant 0.000000e+00 : f32
      %57 = vector.broadcast %cst_89 : f32 to vector<2x1x8x4xf32>
      %c2_90 = arith.constant 2 : index
      %c0_91 = arith.constant 0 : index
      %c1_92 = arith.constant 1 : index
      %c0_93 = arith.constant 0 : index
      %58 = vector.load %arg7[%c2_90, %c0_91, %c1_92, %c0_93] : memref<4x10x10x4xf32, #tpu.memory_space<vmem>>, vector<2x1x8x4xf32>
      tpu.vector_store %arg7[%c2_90, %c0_91, %c1_92, %c0_93], %57 {strides = array<i32>} : memref<4x10x10x4xf32, #tpu.memory_space<vmem>>, vector<2x1x8x4xf32>,
    } else {
    }
    %c0_i32_15 = arith.constant 0 : i32
    %9 = arith.cmpi sgt, %arg1, %c0_i32_15 : i32
    %10 = arith.extui %9 : i1 to i32
    %c0_i32_16 = arith.constant 0 : i32
    %11 = arith.cmpi ne, %10, %c0_i32_16 : i32
    scf.if %11 {
      %c0_89 = arith.constant 0 : index
      %c0_90 = arith.constant 0 : index
      %c0_91 = arith.constant 0 : index
      %c0_92 = arith.constant 0 : index
      %c0_93 = arith.constant 0 : index
      %57 = vector.load %arg3[%c0_89, %c0_90, %c0_91, %c0_92, %c0_93] : memref<1x2x1x8x4xf32, #tpu.memory_space<vmem>>, vector<1x2x1x8x4xf32>
      %58 = vector.shape_cast %57 : vector<1x2x1x8x4xf32> to vector<2x1x8x4xf32>
      %c2_94 = arith.constant 2 : index
      %c0_95 = arith.constant 0 : index
      %c1_96 = arith.constant 1 : index
      %c0_97 = arith.constant 0 : index
      %59 = vector.load %arg7[%c2_94, %c0_95, %c1_96, %c0_97] : memref<4x10x10x4xf32, #tpu.memory_space<vmem>>, vector<2x1x8x4xf32>
      tpu.vector_store %arg7[%c2_94, %c0_95, %c1_96, %c0_97], %58 {strides = array<i32>} : memref<4x10x10x4xf32, #tpu.memory_space<vmem>>, vector<2x1x8x4xf32>,
    } else {
    }
    %c0_i32_17 = arith.constant 0 : i32
    %12 = arith.cmpi eq, %arg1, %c0_i32_17 : i32
    %13 = arith.extui %12 : i1 to i32
    %c0_i32_18 = arith.constant 0 : i32
    %14 = arith.cmpi ne, %13, %c0_i32_18 : i32
    scf.if %14 {
      %cst_89 = arith.constant 0.000000e+00 : f32
      %57 = vector.broadcast %cst_89 : f32 to vector<2x1x8x4xf32>
      %c0_90 = arith.constant 0 : index
      %c9_91 = arith.constant 9 : index
      %c1_92 = arith.constant 1 : index
      %c0_93 = arith.constant 0 : index
      %58 = vector.load %arg7[%c0_90, %c9_91, %c1_92, %c0_93] : memref<4x10x10x4xf32, #tpu.memory_space<vmem>>, vector<2x1x8x4xf32>
      tpu.vector_store %arg7[%c0_90, %c9_91, %c1_92, %c0_93], %57 {strides = array<i32>} : memref<4x10x10x4xf32, #tpu.memory_space<vmem>>, vector<2x1x8x4xf32>,
    } else {
    }
    %c0_i32_19 = arith.constant 0 : i32
    %15 = arith.cmpi slt, %arg1, %c0_i32_19 : i32
    %16 = arith.extui %15 : i1 to i32
    %c0_i32_20 = arith.constant 0 : i32
    %17 = arith.cmpi ne, %16, %c0_i32_20 : i32
    scf.if %17 {
      %c0_89 = arith.constant 0 : index
      %c0_90 = arith.constant 0 : index
      %c0_91 = arith.constant 0 : index
      %c0_92 = arith.constant 0 : index
      %c0_93 = arith.constant 0 : index
      %57 = vector.load %arg4[%c0_89, %c0_90, %c0_91, %c0_92, %c0_93] : memref<1x2x1x8x4xf32, #tpu.memory_space<vmem>>, vector<1x2x1x8x4xf32>
      %58 = vector.shape_cast %57 : vector<1x2x1x8x4xf32> to vector<2x1x8x4xf32>
      %c0_94 = arith.constant 0 : index
      %c9_95 = arith.constant 9 : index
      %c1_96 = arith.constant 1 : index
      %c0_97 = arith.constant 0 : index
      %59 = vector.load %arg7[%c0_94, %c9_95, %c1_96, %c0_97] : memref<4x10x10x4xf32, #tpu.memory_space<vmem>>, vector<2x1x8x4xf32>
      tpu.vector_store %arg7[%c0_94, %c9_95, %c1_96, %c0_97], %58 {strides = array<i32>} : memref<4x10x10x4xf32, #tpu.memory_space<vmem>>, vector<2x1x8x4xf32>,
    } else {
    }
    %c3 = arith.constant 3 : index
    %c0_21 = arith.constant 0 : index
    %c0_22 = arith.constant 0 : index
    %c0_23 = arith.constant 0 : index
    %18 = vector.load %arg7[%c3, %c0_21, %c0_22, %c0_23] : memref<4x10x10x4xf32, #tpu.memory_space<vmem>>, vector<1x8x8x4xf32>
    %19 = vector.shape_cast %18 : vector<1x8x8x4xf32> to vector<8x8x4xf32>
    %c2 = arith.constant 2 : index
    %c0_24 = arith.constant 0 : index
    %c1_25 = arith.constant 1 : index
    %c0_26 = arith.constant 0 : index
    %20 = vector.load %arg7[%c2, %c0_24, %c1_25, %c0_26] : memref<4x10x10x4xf32, #tpu.memory_space<vmem>>, vector<1x8x8x4xf32>
    %21 = vector.shape_cast %20 : vector<1x8x8x4xf32> to vector<8x8x4xf32>
    %c3_27 = arith.constant 3 : index
    %c0_28 = arith.constant 0 : index
    %c1_29 = arith.constant 1 : index
    %c0_30 = arith.constant 0 : index
    %22 = vector.load %arg7[%c3_27, %c0_28, %c1_29, %c0_30] : memref<4x10x10x4xf32, #tpu.memory_space<vmem>>, vector<1x8x8x4xf32>
    %23 = vector.shape_cast %22 : vector<1x8x8x4xf32> to vector<8x8x4xf32>
    %c2_31 = arith.constant 2 : index
    %c0_32 = arith.constant 0 : index
    %c2_33 = arith.constant 2 : index
    %c0_34 = arith.constant 0 : index
    %24 = vector.load %arg7[%c2_31, %c0_32, %c2_33, %c0_34] : memref<4x10x10x4xf32, #tpu.memory_space<vmem>>, vector<1x8x8x4xf32>
    %25 = vector.shape_cast %24 : vector<1x8x8x4xf32> to vector<8x8x4xf32>
    %c1_35 = arith.constant 1 : index
    %c1_36 = arith.constant 1 : index
    %c0_37 = arith.constant 0 : index
    %c0_38 = arith.constant 0 : index
    %26 = vector.load %arg7[%c1_35, %c1_36, %c0_37, %c0_38] : memref<4x10x10x4xf32, #tpu.memory_space<vmem>>, vector<1x8x8x4xf32>
    %27 = vector.shape_cast %26 : vector<1x8x8x4xf32> to vector<8x8x4xf32>
    %c0_39 = arith.constant 0 : index
    %c1_40 = arith.constant 1 : index
    %c1_41 = arith.constant 1 : index
    %c0_42 = arith.constant 0 : index
    %28 = vector.load %arg7[%c0_39, %c1_40, %c1_41, %c0_42] : memref<4x10x10x4xf32, #tpu.memory_space<vmem>>, vector<1x8x8x4xf32>
    %29 = vector.shape_cast %28 : vector<1x8x8x4xf32> to vector<8x8x4xf32>
    %c1_43 = arith.constant 1 : index
    %c1_44 = arith.constant 1 : index
    %c1_45 = arith.constant 1 : index
    %c0_46 = arith.constant 0 : index
    %30 = vector.load %arg7[%c1_43, %c1_44, %c1_45, %c0_46] : memref<4x10x10x4xf32, #tpu.memory_space<vmem>>, vector<1x8x8x4xf32>
    %31 = vector.shape_cast %30 : vector<1x8x8x4xf32> to vector<8x8x4xf32>
    %c0_47 = arith.constant 0 : index
    %c1_48 = arith.constant 1 : index
    %c2_49 = arith.constant 2 : index
    %c0_50 = arith.constant 0 : index
    %32 = vector.load %arg7[%c0_47, %c1_48, %c2_49, %c0_50] : memref<4x10x10x4xf32, #tpu.memory_space<vmem>>, vector<1x8x8x4xf32>
    %33 = vector.shape_cast %32 : vector<1x8x8x4xf32> to vector<8x8x4xf32>
    %c3_51 = arith.constant 3 : index
    %c1_52 = arith.constant 1 : index
    %c0_53 = arith.constant 0 : index
    %c0_54 = arith.constant 0 : index
    %34 = vector.load %arg7[%c3_51, %c1_52, %c0_53, %c0_54] : memref<4x10x10x4xf32, #tpu.memory_space<vmem>>, vector<1x8x8x4xf32>
    %35 = vector.shape_cast %34 : vector<1x8x8x4xf32> to vector<8x8x4xf32>
    %c2_55 = arith.constant 2 : index
    %c1_56 = arith.constant 1 : index
    %c1_57 = arith.constant 1 : index
    %c0_58 = arith.constant 0 : index
    %36 = vector.load %arg7[%c2_55, %c1_56, %c1_57, %c0_58] : memref<4x10x10x4xf32, #tpu.memory_space<vmem>>, vector<1x8x8x4xf32>
    %37 = vector.shape_cast %36 : vector<1x8x8x4xf32> to vector<8x8x4xf32>
    %c3_59 = arith.constant 3 : index
    %c1_60 = arith.constant 1 : index
    %c1_61 = arith.constant 1 : index
    %c0_62 = arith.constant 0 : index
    %38 = vector.load %arg7[%c3_59, %c1_60, %c1_61, %c0_62] : memref<4x10x10x4xf32, #tpu.memory_space<vmem>>, vector<1x8x8x4xf32>
    %39 = vector.shape_cast %38 : vector<1x8x8x4xf32> to vector<8x8x4xf32>
    %c2_63 = arith.constant 2 : index
    %c1_64 = arith.constant 1 : index
    %c2_65 = arith.constant 2 : index
    %c0_66 = arith.constant 0 : index
    %40 = vector.load %arg7[%c2_63, %c1_64, %c2_65, %c0_66] : memref<4x10x10x4xf32, #tpu.memory_space<vmem>>, vector<1x8x8x4xf32>
    %41 = vector.shape_cast %40 : vector<1x8x8x4xf32> to vector<8x8x4xf32>
    %c1_67 = arith.constant 1 : index
    %c2_68 = arith.constant 2 : index
    %c0_69 = arith.constant 0 : index
    %c0_70 = arith.constant 0 : index
    %42 = vector.load %arg7[%c1_67, %c2_68, %c0_69, %c0_70] : memref<4x10x10x4xf32, #tpu.memory_space<vmem>>, vector<1x8x8x4xf32>
    %43 = vector.shape_cast %42 : vector<1x8x8x4xf32> to vector<8x8x4xf32>
    %c0_71 = arith.constant 0 : index
    %c2_72 = arith.constant 2 : index
    %c1_73 = arith.constant 1 : index
    %c0_74 = arith.constant 0 : index
    %44 = vector.load %arg7[%c0_71, %c2_72, %c1_73, %c0_74] : memref<4x10x10x4xf32, #tpu.memory_space<vmem>>, vector<1x8x8x4xf32>
    %45 = vector.shape_cast %44 : vector<1x8x8x4xf32> to vector<8x8x4xf32>
    %c1_75 = arith.constant 1 : index
    %c2_76 = arith.constant 2 : index
    %c1_77 = arith.constant 1 : index
    %c0_78 = arith.constant 0 : index
    %46 = vector.load %arg7[%c1_75, %c2_76, %c1_77, %c0_78] : memref<4x10x10x4xf32, #tpu.memory_space<vmem>>, vector<1x8x8x4xf32>
    %47 = vector.shape_cast %46 : vector<1x8x8x4xf32> to vector<8x8x4xf32>
    %c0_79 = arith.constant 0 : index
    %c2_80 = arith.constant 2 : index
    %c2_81 = arith.constant 2 : index
    %c0_82 = arith.constant 0 : index
    %48 = vector.load %arg7[%c0_79, %c2_80, %c2_81, %c0_82] : memref<4x10x10x4xf32, #tpu.memory_space<vmem>>, vector<1x8x8x4xf32>
    %49 = vector.shape_cast %48 : vector<1x8x8x4xf32> to vector<8x8x4xf32>
    %50 = tpu.concatenate %19, %21, %23, %25, %27, %29, %31, %33, %35, %37, %39, %41, %43, %45, %47, %49 in 2 : vector<8x8x4xf32>, vector<8x8x4xf32>, vector<8x8x4xf32>, vector<8x8x4xf32>, vector<8x8x4xf32>, vector<8x8x4xf32>, vector<8x8x4xf32>, vector<8x8x4xf32>, vector<8x8x4xf32>, vector<8x8x4xf32>, vector<8x8x4xf32>, vector<8x8x4xf32>, vector<8x8x4xf32>, vector<8x8x4xf32>, vector<8x8x4xf32>, vector<8x8x4xf32> -> vector<8x8x64xf32>
    %51 = vector.shape_cast %50 : vector<8x8x64xf32> to vector<64x64xf32>
    %c0_83 = arith.constant 0 : index
    %c0_84 = arith.constant 0 : index
    %52 = vector.load %arg5[%c0_83, %c0_84] : memref<8x64xf32, #tpu.memory_space<vmem>>, vector<8x64xf32>
    %cst_85 = arith.constant dense<0.000000e+00> : vector<8x64xf32>
    %53 = tpu.matmul %52, %51, %cst_85 {dimension_numbers = #tpu.dot_dimension_numbers<[1], [1], [0], [0], [0, 0, 1, 0], [], []>} : vector<8x64xf32>, vector<64x64xf32>, vector<8x64xf32> -> vector<8x64xf32>
    %c0_86 = arith.constant 0 : index
    %c0_87 = arith.constant 0 : index
    %c0_88 = arith.constant 0 : index
    %54 = vector.load %arg6[%c0_86, %c0_87, %c0_88] : memref<1x8x64xf32, #tpu.memory_space<vmem>>, vector<1x8x64xf32>
    %55 = vector.shape_cast %54 : vector<1x8x64xf32> to vector<8x64xf32>
    %56 = vector.shape_cast %53 : vector<8x64xf32> to vector<1x8x64xf32>
    tpu.vector_store %arg6[%c0_86, %c0_87, %c0_88], %56 {strides = array<i32>} : memref<1x8x64xf32, #tpu.memory_space<vmem>>, vector<1x8x64xf32>,
    return
  }
  func.func @transform_0(%arg0: i32, %arg1: i32) -> (i32, i32, i32, i32, i32) {
    %c0_i32 = arith.constant 0 : i32
    %c0_i32_0 = arith.constant 0 : i32
    %c0_i32_1 = arith.constant 0 : i32
    %c0_i32_2 = arith.constant 0 : i32
    return %arg0, %c0_i32, %arg1, %c0_i32_0, %c0_i32_1 : i32, i32, i32, i32, i32
  }
  func.func @transform_1(%arg0: i32, %arg1: i32) -> (i32, i32, i32, i32, i32) {
    %c8_i32 = arith.constant 8 : i32
    %0 = arith.muli %arg1, %c8_i32 : i32
    %c1_i32 = arith.constant 1 : i32
    %1 = arith.subi %0, %c1_i32 : i32
    %c0_i32 = arith.constant 0 : i32
    %2 = arith.maxsi %1, %c0_i32 : i32
    %c1_i32_0 = arith.constant 1 : i32
    %c0_i32_1 = arith.constant 0 : i32
    %c0_i32_2 = arith.constant 0 : i32
    %c0_i32_3 = arith.constant 0 : i32
    return %arg0, %c1_i32_0, %2, %c0_i32_1, %c0_i32_2 : i32, i32, i32, i32, i32
  }
  func.func @transform_2(%arg0: i32, %arg1: i32) -> (i32, i32, i32, i32, i32) {
    %c8_i32 = arith.constant 8 : i32
    %0 = arith.muli %arg1, %c8_i32 : i32
    %c8_i32_0 = arith.constant 8 : i32
    %1 = arith.addi %0, %c8_i32_0 : i32
    %c7_i32 = arith.constant 7 : i32
    %2 = arith.minsi %1, %c7_i32 : i32
    %c0_i32 = arith.constant 0 : i32
    %c0_i32_1 = arith.constant 0 : i32
    %c0_i32_2 = arith.constant 0 : i32
    %c0_i32_3 = arith.constant 0 : i32
    return %arg0, %c0_i32, %2, %c0_i32_1, %c0_i32_2 : i32, i32, i32, i32, i32
  }
  func.func @transform_3(%arg0: i32, %arg1: i32) -> (i32, i32) {
    %c0_i32 = arith.constant 0 : i32
    %c0_i32_0 = arith.constant 0 : i32
    %c0_i32_1 = arith.constant 0 : i32
    return %c0_i32, %c0_i32_0 : i32, i32
  }
  func.func @transform_4(%arg0: i32, %arg1: i32) -> (i32, i32, i32) {
    %c0_i32 = arith.constant 0 : i32
    %c0_i32_0 = arith.constant 0 : i32
    return %arg0, %c0_i32, %arg1 : i32, i32, i32
  }
}

</mosaic_0001>

<bundles_post_ra>
// kernel: downsample_rest.1
= control target key start
LH: loop header
LB: loop body
LE: loop exit
PB: predicated region body
PF: predicated region fallthrough
CT: control target
= control target key end

     0   :  { %s2045_s15 = smov 0   ;;  %s2047_s16 = smov 0   ;;  %s2587_s0 = inlined_call_operand.vmem [shape: f32[2,4,8,8,4], index: 0, kind: input, shape index: {}, may-alias: {0,1,2}]   ;;  %s2588_s1 = inlined_call_operand.vmem [shape: f32[2,4,8,8,4], index: 1, kind: input, shape index: {}, may-alias: {0,1,2}]   ;;  %s2589_s2 = inlined_call_operand.vmem [shape: f32[2,4,8,8,4], index: 2, kind: input, shape index: {}, may-alias: {0,1,2}]   ;;  %s2590_s3 = inlined_call_operand.vmem [shape: f32[8,64], index: 3, kind: input, shape index: {}]   ;;  %s2591_s4 = inlined_call_operand.vmem [shape: f32[2,8,64], index: 4, kind: output, shape index: {}]  }
   0x1   :  { %s2049_s17 = smov 0  }
   0x2 LB: > { %s26_s1 = sadd.s32 1, %s1996_s16  ;;  %p1537_p1 = scmp.ge.s32.totalorder %s2000_s17, 2  ;;  %s2000_s17 = sphi %s2049_s17, %s14_s17   ;;  %s1996_s16 = sphi %s2047_s16, %s2610_s16   ;;  %s1992_s15 = sphi %s2045_s15, %s2609_s15  }
   0x3   : > { %p28_p0 = scmp.ge.s32.totalorder %s26_s1, 2  ;;  %p1546_p2 = scmp.ge.s32.totalorder %s2000_s17, 1 }
   0x4   : > { %p310_p3 = scmp.lt.s32.totalorder %s2000_s17, 3 }
   0x5   : > { %s2612_s1 = smov (%p28_p0, %s26_s1), 0 }
   0x6   : > { %p311_p4 = pnand %p1546_p2, %p310_p3 }
   0x7   : > { %p365_p5 = scmp.lt.s32.totalorder (!%p311_p4), %s1992_s15, 1  ;;  %vm422_vm0 = vcmask (!%p311_p4), 31744   ;;  %vm455_vm1 = vcmask (!%p311_p4), 24576   ;;  %v2002_v0 = vmov (!%p311_p4), 0.0   ;;  %s2003_s21 = smov (!%p311_p4), 12   ;;  %vm2019_vm2 = vmmov (!%p311_p4), 0  }
   0x8   : > { %314 = sbr.rel (%p311_p4) target bundleno = 496 (0x1f0), region = 104  ;;  %516 = vst.msk [vmem:[#allocation2 + $0x149] sm:$0x1] (!%p311_p4), %vm455_vm1, %v2002_v0  ;;  %517 = vst.msk [vmem:[#allocation2 + $0x159] sm:$0x1] (!%p311_p4), %vm455_vm1, %v2002_v0  ;;  %s2004_s22 = smov (!%p311_p4), 4   ;;  %1593 = vmatprep.mubr.msk.f32.mxu0 (!%p311_p4), %vm2019_vm2, %v2002_v0 }
   0x9   : > { %541 = vst.msk [vmem:[#allocation2 + $0x141] sm:$0xff] (!%p311_p4), %vm422_vm0, %v2002_v0  ;;  %542 = vst.msk [vmem:[#allocation2 + $0x1e1] sm:$0xff] (!%p311_p4), %vm422_vm0, %v2002_v0  ;;  %s2005_s23 = smov (!%p311_p4), 8   ;;  %s2006_s24 = smov (!%p311_p4), 16   ;;  %vm1190_vm3 = vcmask (!%p311_p4), 64512   ;;  %vm1199_vm4 = vcmask (!%p311_p4), 97280  }
   0xa   : > { %467 = vst.msk [vmem:[#allocation2 + $0xb0] sm:$0x1] (!%p311_p4), %vm455_vm1, %v2002_v0  ;;  %468 = vst.msk [vmem:[#allocation2 + $0xc0] sm:$0x1] (!%p311_p4), %vm455_vm1, %v2002_v0  ;;  %s2007_s25 = smov (!%p311_p4), 24   ;;  %s2008_s26 = smov (!%p311_p4), 20  }
   0xb   : > { %469 = vst.msk [vmem:[#allocation2 + $0xd0] sm:$0x1] (!%p311_p4), %vm455_vm1, %v2002_v0  ;;  %470 = vst.msk [vmem:[#allocation2 + $0xe0] sm:$0x1] (!%p311_p4), %vm455_vm1, %v2002_v0  ;;  %s2009_s27 = smov (!%p311_p4), 32   ;;  %s2010_s28 = smov (!%p311_p4), 28  }
   0xc   : > { %471 = vst.msk [vmem:[#allocation2 + $0xf0] sm:$0x1] (!%p311_p4), %vm455_vm1, %v2002_v0  ;;  %472 = vst.msk [vmem:[#allocation2 + $0x100] sm:$0x1] (!%p311_p4), %vm455_vm1, %v2002_v0  ;;  %s2011_s29 = smov (!%p311_p4), 36   ;;  %s2012_s30 = smov (!%p311_p4), 40  }
   0xd   : > { %473 = vst.msk [vmem:[#allocation2 + $0x110] sm:$0x1] (!%p311_p4), %vm455_vm1, %v2002_v0  ;;  %474 = vst.msk [vmem:[#allocation2 + $0x120] sm:$0x1] (!%p311_p4), %vm455_vm1, %v2002_v0  ;;  %s2013_s5 = smov (!%p311_p4), 44   ;;  %s2014_s6 = smov (!%p311_p4), 48  }
   0xe   : > { %475 = vst.msk [vmem:[#allocation2 + $0x130] sm:$0x1] (!%p311_p4), %vm455_vm1, %v2002_v0  ;;  %486 = vst.msk [vmem:[#allocation2 + $0x1e0] sm:$0x1] (!%p311_p4), %vm455_vm1, %v2002_v0  ;;  %s2015_s7 = smov (!%p311_p4), 52   ;;  %s2017_s8 = smov (!%p311_p4), 56  }
   0xf   : > { %487 = vst.msk [vmem:[#allocation2 + $0x1f0] sm:$0x1] %vm455_vm1, %v2002_v0  ;;  %488 = vst.msk [vmem:[#allocation2 + $0x200] sm:$0x1] %vm455_vm1, %v2002_v0  ;;  %s2614_s15 = smov (!%p365_p5, %s1992_s15), 1  ;;  %s2018_s9 = smov 60  }
  0x10   : > { %489 = vst.msk [vmem:[#allocation2 + $0x210] sm:$0x1] %vm455_vm1, %v2002_v0  ;;  %490 = vst.msk [vmem:[#allocation2 + $0x220] sm:$0x1] %vm455_vm1, %v2002_v0  ;;  %s1566_s2 = sshll.u32 %s2614_s15, 8  ;;  %v593_v10 = vld [vmem:[#allocation2 + $0x142] sm:$0xff] }
  0x11   : > { %491 = vst.msk [vmem:[#allocation2 + $0x230] sm:$0x1] %vm455_vm1, %v2002_v0  ;;  %492 = vst.msk [vmem:[#allocation2 + $0x240] sm:$0x1] %vm455_vm1, %v2002_v0  ;;  %s2156_s20 = scalar_lea.vmem %s2587_s0, %s1566_s2  ;;  %v577_v11 = vld [vmem:[#allocation2 + $0x141] sm:$0xff]  ;;  %vm1208_vm5 = vcmask 130048  }
  0x12   : > { %493 = vst.msk [vmem:[#allocation2 + $0x250] sm:$0x1] %vm455_vm1, %v2002_v0  ;;  %494 = vst.msk [vmem:[#allocation2 + $0x260] sm:$0x1] %vm455_vm1, %v2002_v0  ;;  %v405_v1 = vld [vmem:[%s2156_s20 + $0x80] sm:$0xff]  ;;  %v398_v4 = vld [vmem:[%s2156_s20 + $0x48] sm:$0xff] }
  0x13   : > { %497 = vst.msk [vmem:[#allocation2 + $0x19] sm:$0x1] %vm455_vm1, %v2002_v0  ;;  %498 = vst.msk [vmem:[#allocation2 + $0x29] sm:$0x1] %vm455_vm1, %v2002_v0  ;;  %v413_v2 = vld [vmem:[%s2156_s20 + $0xc0] sm:$0xff]  ;;  %v390_v6 = vld [vmem:[%s2156_s20 + $0x8] sm:$0xff] }
  0x14   : > { %499 = vst.msk [vmem:[#allocation2 + $0x39] sm:$0x1] %vm455_vm1, %v2002_v0  ;;  %500 = vst.msk [vmem:[#allocation2 + $0x49] sm:$0x1] %vm455_vm1, %v2002_v0  ;;  %v397_v3 = vld [vmem:[%s2156_s20 + $0x40] sm:$0xff]  ;;  %v414_v7 = vld [vmem:[%s2156_s20 + $0xc8] sm:$0xff] }
  0x15   : > { %501 = vst.msk [vmem:[#allocation2 + $0x59] sm:$0x1] %vm455_vm1, %v2002_v0  ;;  %502 = vst.msk [vmem:[#allocation2 + $0x69] sm:$0x1] %vm455_vm1, %v2002_v0  ;;  %v389_v5 = vld [vmem:[%s2156_s20] sm:$0xff]  ;;  %v406_v8 = vld [vmem:[%s2156_s20 + $0x88] sm:$0xff] }
  0x16   : > { %503 = vst.msk [vmem:[#allocation2 + $0x79] sm:$0x1] %vm455_vm1, %v2002_v0  ;;  %504 = vst.msk [vmem:[#allocation2 + $0x89] sm:$0x1] %vm455_vm1, %v2002_v0  ;;  %v407_v9 = vld [vmem:[%s2156_s20 + $0x90] sm:$0xff]  ;;  %v400_v14 = vld [vmem:[%s2156_s20 + $0x58] sm:$0xff] }
  0x17   : > { %505 = vst.msk [vmem:[#allocation2 + $0x99] sm:$0x1] %vm455_vm1, %v2002_v0  ;;  %518 = vst.msk [vmem:[#allocation2 + $0x169] sm:$0x1] %vm455_vm1, %v2002_v0  ;;  %v415_v12 = vld [vmem:[%s2156_s20 + $0xd0] sm:$0xff]  ;;  %v392_v16 = vld [vmem:[%s2156_s20 + $0x18] sm:$0xff] }
  0x18   : > { %519 = vst.msk [vmem:[#allocation2 + $0x179] sm:$0x1] %vm455_vm1, %v2002_v0  ;;  %520 = vst.msk [vmem:[#allocation2 + $0x189] sm:$0x1] %vm455_vm1, %v2002_v0  ;;  %v399_v13 = vld [vmem:[%s2156_s20 + $0x50] sm:$0xff]  ;;  %v408_v17 = vld [vmem:[%s2156_s20 + $0x98] sm:$0xff] }
  0x19   : > { %521 = vst.msk [vmem:[#allocation2 + $0x199] sm:$0x1] %vm455_vm1, %v2002_v0  ;;  %522 = vst.msk [vmem:[#allocation2 + $0x1a9] sm:$0x1] %vm455_vm1, %v2002_v0  ;;  %v391_v15 = vld [vmem:[%s2156_s20 + $0x10] sm:$0xff]  ;;  %v585_v18 = vld [vmem:[#allocation2 + $0x1e1] sm:$0xff] }
  0x1a   : > { %523 = vst.msk [vmem:[#allocation2 + $0x1b9] sm:$0x1] %vm455_vm1, %v2002_v0  ;;  %524 = vst.msk [vmem:[#allocation2 + $0x1c9] sm:$0x1] %vm455_vm1, %v2002_v0  ;;  %v409_v19 = vld [vmem:[%s2156_s20 + $0xa0] sm:$0xff]  ;;  %v416_v20 = vld [vmem:[%s2156_s20 + $0xd8] sm:$0xff] }
  0x1b   : > { %556 = vst.msk [vmem:[#allocation2 + $0x91] sm:$0xff] %vm422_vm0, %v2002_v0  ;;  %557 = vst.msk [vmem:[#allocation2 + $0x131] sm:$0xff] %vm422_vm0, %v2002_v0  ;;  %v417_v21 = vld [vmem:[%s2156_s20 + $0xe0] sm:$0xff]  ;;  %v402_v23 = vld [vmem:[%s2156_s20 + $0x68] sm:$0xff]  ;;  %vm1217_vm6 = vcmask 162816   ;;  %vm1226_vm7 = vcmask 195584  }
  0x1c   : > { %439 = vst.msk [vmem:[#allocation2 + $0x151] sm:$0xff] %vm422_vm0, %v405_v1  ;;  %447 = vst.msk [vmem:[#allocation2 + $0x1f1] sm:$0xff] %vm422_vm0, %v413_v2  ;;  %v401_v22 = vld [vmem:[%s2156_s20 + $0x60] sm:$0xff]  ;;  %v394_v48 = vld [vmem:[%s2156_s20 + $0x28] sm:$0xff]  ;;  %vm1235_vm8 = vcmask 228352   ;;  %vm2594_vm9 = vcmask 261120  }
  0x1d   : > { %431 = vst.msk [vmem:[#allocation2 + $0xb1] sm:$0xff] %vm422_vm0, %v397_v3  ;;  %432 = vst.msk [vmem:[#allocation2 + $0xc1] sm:$0xff] %vm422_vm0, %v398_v4  ;;  %v393_v24 = vld [vmem:[%s2156_s20 + $0x20] sm:$0xff]  ;;  %v418_v50 = vld [vmem:[%s2156_s20 + $0xe8] sm:$0xff]  ;;  %vm1253_vm10 = vcmask 293888   ;;  %vm1262_vm11 = vcmask 326656  }
  0x1e   : > { %423 = vst.msk [vmem:[#allocation2 + $0x11] sm:$0xff] %vm422_vm0, %v389_v5  ;;  %424 = vst.msk [vmem:[#allocation2 + $0x21] sm:$0xff] %vm422_vm0, %v390_v6  ;;  %v410_v51 = vld [vmem:[%s2156_s20 + $0xa8] sm:$0xff]  ;;  %v411_v55 = vld [vmem:[%s2156_s20 + $0xb0] sm:$0xff]  ;;  %vm1271_vm12 = vcmask 359424   ;;  %vm2592_vm13 = vcmask 392192  }
  0x1f   : > { %448 = vst.msk [vmem:[#allocation2 + $0x201] sm:$0xff] %vm422_vm0, %v414_v7  ;;  %440 = vst.msk [vmem:[#allocation2 + $0x161] sm:$0xff] %vm422_vm0, %v406_v8  ;;  %v419_v56 = vld [vmem:[%s2156_s20 + $0xf0] sm:$0xff]  ;;  %v404_v58 = vld [vmem:[%s2156_s20 + $0x78] sm:$0xff]  ;;  %vm1289_vm14 = vcmask 424960   ;;  %vm1298_vm15 = vcmask 457728  }
  0x20   : > { %441 = vst.msk [vmem:[#allocation2 + $0x171] sm:$0xff] %vm422_vm0, %v407_v9  ;;  %449 = vst.msk [vmem:[#allocation2 + $0x211] sm:$0xff] %vm422_vm0, %v415_v12  ;;  %v403_v57 = vld [vmem:[%s2156_s20 + $0x70] sm:$0xff]  ;;  %v396_v60 = vld [vmem:[%s2156_s20 + $0x38] sm:$0xff]  ;;  %vm1307_vm1 = vcmask 490496   ;;  %vm2593_vm2 = vcmask 523264  }
  0x21   : > { %433 = vst.msk [vmem:[#allocation2 + $0xd1] sm:$0xff] %vm422_vm0, %v399_v13  ;;  %434 = vst.msk [vmem:[#allocation2 + $0xe1] sm:$0xff] %vm422_vm0, %v400_v14  ;;  %v395_v59 = vld [vmem:[%s2156_s20 + $0x30] sm:$0xff]  ;;  %v420_v61 = vld [vmem:[%s2156_s20 + $0xf8] sm:$0xff]  ;;  %s1551_s12 = sshll.u32 %s2614_s15, 3 }
  0x22   : > { %425 = vst.msk [vmem:[#allocation2 + $0x31] sm:$0xff] %vm422_vm0, %v391_v15  ;;  %426 = vst.msk [vmem:[#allocation2 + $0x41] sm:$0xff] %vm422_vm0, %v392_v16  ;;  %v412_v62 = vld [vmem:[%s2156_s20 + $0xb8] sm:$0xff]  ;;  %s388_s2 = scalar_lea.vmem %s2591_s4, %s1551_s12 }
  0x23   : > { %442 = vst.msk [vmem:[#allocation2 + $0x181] sm:$0xff] %vm422_vm0, %v408_v17  ;;  %443 = vst.msk [vmem:[#allocation2 + $0x191] sm:$0xff] %vm422_vm0, %v409_v19  ;;  %v2197_v25 = vld [vmem:[#allocation2 + $0x152] sm:$0xff] }
  0x24   : > { %450 = vst.msk [vmem:[#allocation2 + $0x221] sm:$0xff] %vm422_vm0, %v416_v20  ;;  %451 = vst.msk [vmem:[#allocation2 + $0x231] sm:$0xff] %vm422_vm0, %v417_v21  ;;  %v2199_v26 = vld [vmem:[#allocation2 + $0x151] sm:$0xff]  ;;  %v1680_v28 = vpack.i.bf16 %v2197_v25, %v593_v10  ;;  %v2208_v31 = vld [vmem:[#allocation2 + $0xc0] sm:$0xff]  ;;  %v2016_v20 = vmov 0.0|0.0  }
  0x25   : > { %v2201_v27 = vld [vmem:[#allocation2 + $0x1f1] sm:$0xff]  ;;  %435 = vst.msk [vmem:[#allocation2 + $0xf1] sm:$0xff] %vm422_vm0, %v401_v22  ;;  %436 = vst.msk [vmem:[#allocation2 + $0x101] sm:$0xff] %vm422_vm0, %v402_v23  ;;  %v1670_v29 = vpack.i.bf16 %v2199_v26, %v577_v11  ;;  %v2214_v35 = vld [vmem:[#allocation2 + $0xc1] sm:$0xff]  ;;  %1596 = vmatprep.subr.bf16.mxu0 %v2016_v20 }
  0x26   : > { %427 = vst.msk [vmem:[#allocation2 + $0x51] sm:$0xff] %vm422_vm0, %v393_v24  ;;  %v602_v30 = vld [vmem:[#allocation2 + $0xb0] sm:$0xff]  ;;  %1681 = vrot.lane.b32.xlu1 %v1680_v28, %s2003_s21  ;;  %v1675_v32 = vpack.i.bf16 %v2201_v27, %v585_v18  ;;  %v2216_v37 = vld [vmem:[#allocation2 + $0x21] sm:$0xff]  ;;  %428 = vst.msk [vmem:[#allocation2 + $0x61] sm:$0xff] %vm422_vm0, %v394_v48 }
  0x27   : > { %1671 = vrot.lane.b32.xlu0 %v1670_v29, %s2004_s22  ;;  %v1685_v33 = vpack.i.bf16 %v2208_v31, %v602_v30  ;;  %v618_v34 = vld [vmem:[#allocation2 + $0xb1] sm:$0xff]  ;;  %v2224_v41 = vld [vmem:[#allocation2 + $0x200] sm:$0xff]  ;;  %452 = vst.msk [vmem:[#allocation2 + $0x241] sm:$0xff] %vm422_vm0, %v418_v50  ;;  %444 = vst.msk [vmem:[#allocation2 + $0x1a1] sm:$0xff] %vm422_vm0, %v410_v51 }
  0x28   : > { %v610_v36 = vld [vmem:[#allocation2 + $0x11] sm:$0xff]  ;;  %v1695_v38 = vpack.i.bf16 %v2214_v35, %v618_v34  ;;  %v2226_v43 = vld [vmem:[#allocation2 + $0x22] sm:$0xff]  ;;  %445 = vst.msk [vmem:[#allocation2 + $0x1b1] sm:$0xff] %vm422_vm0, %v411_v55  ;;  %453 = vst.msk [vmem:[#allocation2 + $0x251] sm:$0xff] %vm422_vm0, %v419_v56 }
  0x29   : > { %v1690_v39 = vpack.i.bf16 %v2216_v37, %v610_v36  ;;  %v2222_v40 = vld [vmem:[#allocation2 + $0x1f0] sm:$0xff]  ;;  %v645_v46 = vld [vmem:[#allocation2 + $0x161] sm:$0xff]  ;;  %437 = vst.msk [vmem:[#allocation2 + $0x111] sm:$0xff] %vm422_vm0, %v403_v57  ;;  %438 = vst.msk [vmem:[#allocation2 + $0x121] sm:$0xff] %vm422_vm0, %v404_v58 }
  0x2a   : > { %1686 = vrot.lane.b32.xlu1 %v1685_v33, %s2006_s24  ;;  %v626_v42 = vld [vmem:[#allocation2 + $0x12] sm:$0xff]  ;;  %v1705_v44 = vpack.i.bf16 %v2224_v41, %v2222_v40  ;;  %v653_v49 = vld [vmem:[#allocation2 + $0x201] sm:$0xff]  ;;  %v1715_v52 = vpack.i.bf16 %v645_v46, %v2199_v26  ;;  %429 = vst.msk [vmem:[#allocation2 + $0x71] sm:$0xff] %vm422_vm0, %v395_v59  ;;  %430 = vst.msk [vmem:[#allocation2 + $0x81] sm:$0xff] %vm422_vm0, %v396_v60 }
  0x2b   : > { %1676 = vrot.lane.b32.xlu0 %v1675_v32, %s2005_s23  ;;  %v1700_v45 = vpack.i.bf16 %v2226_v43, %v626_v42  ;;  %v2233_v47 = vld [vmem:[#allocation2 + $0x171] sm:$0xff]  ;;  %454 = vst.msk [vmem:[#allocation2 + $0x261] sm:$0xff] %vm422_vm0, %v420_v61  ;;  %446 = vst.msk [vmem:[#allocation2 + $0x1c1] sm:$0xff] %vm422_vm0, %v412_v62  ;;  %v1725_v63 = vpack.i.bf16 %v653_v49, %v2201_v27  ;;  %v661_v2 = vld [vmem:[#allocation2 + $0x162] sm:$0xff] }
  0x2c   : > { %v1710_v53 = vpack.i.bf16 %v2233_v47, %v645_v46  ;;  %v2243_v54 = vld [vmem:[#allocation2 + $0x211] sm:$0xff]  ;;  %v1735_v4 = vpack.i.bf16 %v661_v2, %v2197_v25  ;;  %v2273_v7 = vld [vmem:[#allocation2 + $0xe0] sm:$0xff] }
  0x2d   : > { %v1720_v1 = vpack.i.bf16 %v2243_v54, %v653_v49  ;;  %v2267_v3 = vld [vmem:[#allocation2 + $0x172] sm:$0xff]  ;;  %v2279_v11 = vld [vmem:[#allocation2 + $0x41] sm:$0xff] }
  0x2e   : > { %1696 = vrot.lane.b32.xlu1 %v1695_v38, %s2007_s25  ;;  %v1730_v5 = vpack.i.bf16 %v2267_v3, %v661_v2  ;;  %v670_v6 = vld [vmem:[#allocation2 + $0xd0] sm:$0xff]  ;;  %v2285_v15 = vld [vmem:[#allocation2 + $0xe1] sm:$0xff] }
  0x2f   : > { %1691 = vrot.lane.b32.xlu0 %v1690_v39, %s2008_s26  ;;  %v1745_v8 = vpack.i.bf16 %v670_v6, %v2208_v31  ;;  %v1740_v9 = vpack.i.bf16 %v2273_v7, %v670_v6  ;;  %v679_v10 = vld [vmem:[#allocation2 + $0x31] sm:$0xff]  ;;  %v629_v19 = vld [vmem:[#allocation2 + $0x42] sm:$0xff] }
  0x30   : > { %v1755_v12 = vpack.i.bf16 %v679_v10, %v2216_v37  ;;  %v1750_v13 = vpack.i.bf16 %v2279_v11, %v679_v10  ;;  %v687_v14 = vld [vmem:[#allocation2 + $0xd1] sm:$0xff]  ;;  %v581_v23 = vld [vmem:[#allocation2 + $0x181] sm:$0xff] }
  0x31   : > { %v1765_v16 = vpack.i.bf16 %v687_v14, %v2214_v35  ;;  %v1760_v17 = vpack.i.bf16 %v2285_v15, %v687_v14  ;;  %v695_v18 = vld [vmem:[#allocation2 + $0x32] sm:$0xff]  ;;  %v2297_v26 = vld [vmem:[#allocation2 + $0x220] sm:$0xff]  ;;  %v1790_v32 = vpack.i.bf16 %v581_v23, %v2233_v47 }
  0x32   : > { %1706 = vrot.lane.b32.xlu1 %v1705_v44, %s2009_s27  ;;  %v1775_v21 = vpack.i.bf16 %v695_v18, %v2226_v43  ;;  %v1770_v22 = vpack.i.bf16 %v629_v19, %v695_v18  ;;  %v582_v24 = vld [vmem:[#allocation2 + $0x191] sm:$0xff]  ;;  %v589_v29 = vld [vmem:[#allocation2 + $0x221] sm:$0xff] }
  0x33   : > { %1701 = vrot.lane.b32.xlu0 %v1700_v45, %s2010_s28  ;;  %v2295_v25 = vld [vmem:[#allocation2 + $0x210] sm:$0xff]  ;;  %v1785_v27 = vpack.i.bf16 %v582_v24, %v581_v23  ;;  %v597_v33 = vld [vmem:[#allocation2 + $0x182] sm:$0xff]  ;;  %v1800_v36 = vpack.i.bf16 %v589_v29, %v2243_v54 }
  0x34   : > { %v1780_v28 = vpack.i.bf16 %v2297_v26, %v2295_v25  ;;  %v590_v30 = vld [vmem:[#allocation2 + $0x231] sm:$0xff]  ;;  %v607_v38 = vld [vmem:[#allocation2 + $0x100] sm:$0xff]  ;;  %v1810_v42 = vpack.i.bf16 %v597_v33, %v2267_v3 }
  0x35   : > { %v1795_v31 = vpack.i.bf16 %v590_v30, %v589_v29  ;;  %v598_v34 = vld [vmem:[#allocation2 + $0x192] sm:$0xff]  ;;  %v615_v44 = vld [vmem:[#allocation2 + $0x61] sm:$0xff] }
  0x36   : > { %1716 = vrot.lane.b32.xlu1 %v1715_v52, %s2011_s29  ;;  %v1805_v35 = vpack.i.bf16 %v598_v34, %v597_v33  ;;  %v606_v37 = vld [vmem:[#allocation2 + $0xf0] sm:$0xff]  ;;  %v623_v48 = vld [vmem:[#allocation2 + $0x101] sm:$0xff] }
  0x37   : > { %1711 = vrot.lane.b32.xlu0 %v1710_v53, %s2004_s22  ;;  %v1815_v39 = vpack.i.bf16 %v607_v38, %v606_v37  ;;  %v614_v43 = vld [vmem:[#allocation2 + $0x51] sm:$0xff]  ;;  %v1820_v46 = vpack.i.bf16 %v606_v37, %v2273_v7  ;;  %v631_v52 = vld [vmem:[#allocation2 + $0x62] sm:$0xff] }
  0x38   : > { %v1825_v45 = vpack.i.bf16 %v615_v44, %v614_v43  ;;  %v622_v47 = vld [vmem:[#allocation2 + $0xf1] sm:$0xff]  ;;  %v1830_v50 = vpack.i.bf16 %v614_v43, %v2279_v11  ;;  %v2323_v56 = vld [vmem:[#allocation2 + $0x240] sm:$0xff] }
  0x39   : > { %v1835_v49 = vpack.i.bf16 %v623_v48, %v622_v47  ;;  %v630_v51 = vld [vmem:[#allocation2 + $0x52] sm:$0xff]  ;;  %v1840_v54 = vpack.i.bf16 %v622_v47, %v2285_v15  ;;  %v649_v59 = vld [vmem:[#allocation2 + $0x1a1] sm:$0xff] }
  0x3a   : > { %1726 = vrot.lane.b32.xlu1 %v1725_v63, %s2012_s30  ;;  %v1845_v53 = vpack.i.bf16 %v631_v52, %v630_v51  ;;  %v2321_v55 = vld [vmem:[#allocation2 + $0x230] sm:$0xff]  ;;  %v1850_v58 = vpack.i.bf16 %v630_v51, %v629_v19  ;;  %v1865_v61 = vpack.i.bf16 %v649_v59, %v582_v24  ;;  %v657_v63 = vld [vmem:[#allocation2 + $0x241] sm:$0xff] }
  0x3b   : > { %1721 = vrot.lane.b32.xlu0 %v1720_v1, %s2005_s23  ;;  %v1855_v57 = vpack.i.bf16 %v2323_v56, %v2321_v55  ;;  %v584_v60 = vld [vmem:[#allocation2 + $0x1b1] sm:$0xff]  ;;  %v1875_v2 = vpack.i.bf16 %v657_v63, %v590_v30  ;;  %v651_v29 = vld [vmem:[#allocation2 + $0x1c1] sm:$0xff] }
  0x3c   : > { %v1860_v62 = vpack.i.bf16 %v584_v60, %v649_v59  ;;  %v592_v1 = vld [vmem:[#allocation2 + $0x251] sm:$0xff]  ;;  %v667_v33 = vld [vmem:[#allocation2 + $0x1c2] sm:$0xff] }
  0x3d   : > { %v1870_v3 = vpack.i.bf16 %v592_v1, %v657_v63  ;;  %v685_v37 = vld [vmem:[#allocation2 + $0x91] sm:$0xff] }
  0x3e   : > { %1736 = vrot.lane.b32.xlu1 %v1735_v4, %s2013_s5  ;;  %v665_v4 = vld [vmem:[#allocation2 + $0x1a2] sm:$0xff]  ;;  %v701_v43 = vld [vmem:[#allocation2 + $0x92] sm:$0xff] }
  0x3f   : > { %1731 = vrot.lane.b32.xlu0 %v1730_v5, %s2003_s21  ;;  %v600_v5 = vld [vmem:[#allocation2 + $0x1b2] sm:$0xff]  ;;  %v1885_v6 = vpack.i.bf16 %v665_v4, %v598_v34 }
  0x40   : > { %v1880_v7 = vpack.i.bf16 %v600_v5, %v665_v4 }
  0x42   : > { %1746 = vrot.lane.b32.xlu1 %v1745_v8, %s2014_s6  ;;  %v674_v8 = vld [vmem:[#allocation2 + $0x110] sm:$0xff] }
  0x43   : > { %1741 = vrot.lane.b32.xlu0 %v1740_v9, %s2006_s24  ;;  %v609_v9 = vld [vmem:[#allocation2 + $0x120] sm:$0xff]  ;;  %v1895_v10 = vpack.i.bf16 %v674_v8, %v607_v38 }
  0x44   : > { %v1890_v11 = vpack.i.bf16 %v609_v9, %v674_v8 }
  0x46   : > { %1756 = vrot.lane.b32.xlu1 %v1755_v12, %s2015_s7  ;;  %v683_v12 = vld [vmem:[#allocation2 + $0x71] sm:$0xff] }
  0x47   : > { %1751 = vrot.lane.b32.xlu0 %v1750_v13, %s2008_s26  ;;  %v617_v13 = vld [vmem:[#allocation2 + $0x81] sm:$0xff]  ;;  %v1905_v14 = vpack.i.bf16 %v683_v12, %v615_v44 }
  0x48   : > { %v1900_v15 = vpack.i.bf16 %v617_v13, %v683_v12 }
  0x4a   : > { %1766 = vrot.lane.b32.xlu1 %v1765_v16, %s2017_s8  ;;  %v691_v16 = vld [vmem:[#allocation2 + $0x111] sm:$0xff] }
  0x4b   : > { %1761 = vrot.lane.b32.xlu0 %v1760_v17, %s2007_s25  ;;  %v625_v17 = vld [vmem:[#allocation2 + $0x121] sm:$0xff]  ;;  %v1915_v18 = vpack.i.bf16 %v691_v16, %v623_v48 }
  0x4c   : > { %v1910_v19 = vpack.i.bf16 %v625_v17, %v691_v16 }
  0x4e   : > { %1776 = vrot.lane.b32.xlu1 %v1775_v21, %s2018_s9  ;;  %v699_v21 = vld [vmem:[#allocation2 + $0x72] sm:$0xff] }
  0x4f   : > { %1771 = vrot.lane.b32.xlu0 %v1770_v22, %s2010_s28  ;;  %v633_v22 = vld [vmem:[#allocation2 + $0x82] sm:$0xff]  ;;  %v1925_v23 = vpack.i.bf16 %v699_v21, %v631_v52 }
  0x50   : > { %v1920_v24 = vpack.i.bf16 %v633_v22, %v699_v21 }
  0x52   : > { %1786 = vrot.lane.b32.xlu1 %v1785_v27, %s2004_s22  ;;  %v2343_v27 = vld [vmem:[#allocation2 + $0x250] sm:$0xff] }
  0x53   : > { %1781 = vrot.lane.b32.xlu0 %v1780_v28, %s2009_s27  ;;  %v642_v28 = vld [vmem:[#allocation2 + $0x260] sm:$0xff] }
  0x54   : > { %v1930_v30 = vpack.i.bf16 %v642_v28, %v2343_v27 }
  0x56   : > { %1796 = vrot.lane.b32.xlu1 %v1795_v31, %s2005_s23  ;;  %v1935_v31 = vpack.i.bf16 %v651_v29, %v584_v60 }
  0x57   : > { %1791 = vrot.lane.b32.xlu0 %v1790_v32, %s2011_s29  ;;  %v659_v32 = vld [vmem:[#allocation2 + $0x261] sm:$0xff] }
  0x58   : > { %v1940_v34 = vpack.i.bf16 %v659_v32, %v592_v1 }
  0x5a   : > { %1806 = vrot.lane.b32.xlu1 %v1805_v35, %s2003_s21  ;;  %v1945_v35 = vpack.i.bf16 %v667_v33, %v600_v5 }
  0x5b   : > { %1801 = vrot.lane.b32.xlu0 %v1800_v36, %s2012_s30  ;;  %v676_v36 = vld [vmem:[#allocation2 + $0x130] sm:$0xff] }
  0x5c   : > { %v1950_v38 = vpack.i.bf16 %v676_v36, %v609_v9 }
  0x5e   : > { %1816 = vrot.lane.b32.xlu1 %v1815_v39, %s2006_s24  ;;  %v1955_v39 = vpack.i.bf16 %v685_v37, %v617_v13 }
  0x5f   : > { %1811 = vrot.lane.b32.xlu0 %v1810_v42, %s2013_s5  ;;  %v693_v42 = vld [vmem:[#allocation2 + $0x131] sm:$0xff] }
  0x60   : > { %v1960_v44 = vpack.i.bf16 %v693_v42, %v625_v17 }
  0x62   : > { %1826 = vrot.lane.b32.xlu1 %v1825_v45, %s2008_s26  ;;  %v1965_v45 = vpack.i.bf16 %v701_v43, %v633_v22 }
  0x63   : > { %1821 = vrot.lane.b32.xlu0 %v1820_v46, %s2014_s6 }
  0x66   : > { %1836 = vrot.lane.b32.xlu1 %v1835_v49, %s2007_s25 }
  0x67   : > { %1831 = vrot.lane.b32.xlu0 %v1830_v50, %s2015_s7 }
  0x6a   : > { %1846 = vrot.lane.b32.xlu1 %v1845_v53, %s2010_s28 }
  0x6b   : > { %1841 = vrot.lane.b32.xlu0 %v1840_v54, %s2017_s8 }
  0x6e   : > { %1856 = vrot.lane.b32.xlu1 %v1855_v57, %s2009_s27  ;;  %v568_v57 = vld [vmem:[#allocation2 + $0x1e0] sm:$0xff] }
  0x6f   : > { %1851 = vrot.lane.b32.xlu0 %v1850_v58, %s2018_s9 }
  0x72   : > { %1866 = vrot.lane.b32.xlu1 %v1865_v61, %s2011_s29 }
  0x73   : > { %1861 = vrot.lane.b32.xlu0 %v1860_v62, %s2004_s22 }
  0x76   : > { %1876 = vrot.lane.b32.xlu1 %v1875_v2, %s2012_s30 }
  0x77   : > { %1871 = vrot.lane.b32.xlu0 %v1870_v3, %s2005_s23 }
  0x7a   : > { %1886 = vrot.lane.b32.xlu1 %v1885_v6, %s2013_s5 }
  0x7b   : > { %1881 = vrot.lane.b32.xlu0 %v1880_v7, %s2003_s21 }
  0x7e   : > { %1896 = vrot.lane.b32.xlu1 %v1895_v10, %s2014_s6 }
  0x7f   : > { %1891 = vrot.lane.b32.xlu0 %v1890_v11, %s2006_s24 }
  0x82   : > { %1906 = vrot.lane.b32.xlu1 %v1905_v14, %s2015_s7 }
  0x83   : > { %1901 = vrot.lane.b32.xlu0 %v1900_v15, %s2008_s26 }
  0x86   : > { %1916 = vrot.lane.b32.xlu1 %v1915_v18, %s2017_s8 }
  0x87   : > { %1911 = vrot.lane.b32.xlu0 %v1910_v19, %s2007_s25 }
  0x8a   : > { %1926 = vrot.lane.b32.xlu1 %v1925_v23, %s2018_s9 }
  0x8b   : > { %1921 = vrot.lane.b32.xlu0 %v1920_v24, %s2010_s28 }
  0x8e   : > { %1936 = vrot.lane.b32.xlu1 %v1935_v31, %s2011_s29 }
  0x8f   : > { %1931 = vrot.lane.b32.xlu0 %v1930_v30, %s2009_s27 }
  0x92   : > { %1946 = vrot.lane.b32.xlu1 %v1945_v35, %s2013_s5 }
  0x93   : > { %1941 = vrot.lane.b32.xlu0 %v1940_v34, %s2012_s30 }
  0x96   : > { %1956 = vrot.lane.b32.xlu1 %v1955_v39, %s2015_s7 }
  0x97   : > { %1951 = vrot.lane.b32.xlu0 %v1950_v38, %s2014_s6 }
  0x98   : > { %v1682_v46 = vpop.permute.xlu1 %1681 }
  0x99   : > { %v1672_v47 = vpop.permute.xlu0 %1671  ;;  %v1684_v5 = vunpack.i.h.bf16 %v1682_v46  ;;  %v1683_v6 = vunpack.i.l.bf16 %v1682_v46 }
  0x9a   : > { %1966 = vrot.lane.b32.xlu1 %v1965_v45, %s2018_s9  ;;  %v1674_v0 = vunpack.i.h.bf16 %v1672_v47  ;;  %v1673_v54 = vunpack.i.l.bf16 %v1672_v47 }
  0x9b   : > { %1961 = vrot.lane.b32.xlu0 %v1960_v44, %s2017_s8 }
  0x9c   : > { %v1687_v49 = vpop.permute.xlu1 %1686  ;;  %v1183_v62 = vsel %vm422_vm0, %v2222_v40, %v1674_v0  ;;  %v1182_v63 = vsel %vm422_vm0, %v568_v57, %v1673_v54 }
  0x9d   : > { %v1677_v48 = vpop.permute.xlu0 %1676  ;;  %v1689_v7 = vunpack.i.h.bf16 %v1687_v49  ;;  %v1688_v8 = vunpack.i.l.bf16 %v1687_v49 }
  0x9e   : > { %v1679_v58 = vunpack.i.h.bf16 %v1677_v48  ;;  %v1678_v59 = vunpack.i.l.bf16 %v1677_v48 }
  0xa0   : > { %v1697_v50 = vpop.permute.xlu1 %1696  ;;  %v1191_v1 = vsel %vm1190_vm3, %v1182_v63, %v1678_v59  ;;  %v1192_v2 = vsel %vm1190_vm3, %v1183_v62, %v1679_v58 }
  0xa1   : > { %v1692_v51 = vpop.permute.xlu0 %1691  ;;  %v1200_v9 = vsel %vm1199_vm4, %v1191_v1, %v1683_v6  ;;  %v1201_v10 = vsel %vm1199_vm4, %v1192_v2, %v1684_v5  ;;  %v1699_v16 = vunpack.i.h.bf16 %v1697_v50  ;;  %v1698_v17 = vunpack.i.l.bf16 %v1697_v50 }
  0xa2   : > { %v1694_v12 = vunpack.i.h.bf16 %v1692_v51  ;;  %v1693_v13 = vunpack.i.l.bf16 %v1692_v51  ;;  %v1210_v14 = vsel %vm1208_vm5, %v1201_v10, %v1689_v7  ;;  %v1209_v15 = vsel %vm1208_vm5, %v1200_v9, %v1688_v8 }
  0xa4   : > { %v2357_v52 = vpop.permute.xlu1 %1706  ;;  %v1219_v21 = vsel %vm1217_vm6, %v1210_v14, %v1694_v12  ;;  %v1218_v22 = vsel %vm1217_vm6, %v1209_v15, %v1693_v13 }
  0xa5   : > { %v1702_v53 = vpop.permute.xlu0 %1701  ;;  %v1709_v28 = vunpack.i.h.bf16 %v2357_v52  ;;  %v1708_v29 = vunpack.i.l.bf16 %v2357_v52  ;;  %v1227_v30 = vsel %vm1226_vm7, %v1218_v22, %v1698_v17  ;;  %v1228_v31 = vsel %vm1226_vm7, %v1219_v21, %v1699_v16 }
  0xa6   : > { %v1704_v23 = vunpack.i.h.bf16 %v1702_v53  ;;  %v1703_v24 = vunpack.i.l.bf16 %v1702_v53 }
  0xa8   : > { %v2359_v60 = vpop.permute.xlu1 %1716  ;;  %v1236_v34 = vsel %vm1235_vm8, %v1227_v30, %v1703_v24  ;;  %v1237_v35 = vsel %vm1235_vm8, %v1228_v31, %v1704_v23 }
  0xa9   : > { %v2361_v61 = vpop.permute.xlu0 %1711  ;;  %v1719_v36 = vunpack.i.h.bf16 %v2359_v60  ;;  %v1718_v37 = vunpack.i.l.bf16 %v2359_v60  ;;  %v1245_v44 = vsel %vm2594_vm9, %v1236_v34, %v1708_v29  ;;  %v1246_v45 = vsel %vm2594_vm9, %v1237_v35, %v1709_v28 }
  0xaa   : > { %v1714_v24 = vunpack.i.h.bf16 %v2361_v61  ;;  %v1713_v28 = vunpack.i.l.bf16 %v2361_v61 }
  0xab   : > { %v1254_v50 = vsel %vm1253_vm10, %v1245_v44, %v1718_v37  ;;  %v1255_v51 = vsel %vm1253_vm10, %v1246_v45, %v1719_v36 }
  0xac   : > { %v1727_v3 = vpop.permute.xlu1 %1726  ;;  %v1184_v61 = vsel %vm422_vm0, %v2224_v41, %v1713_v28 }
  0xad   : > { %v2368_v4 = vpop.permute.xlu0 %1721  ;;  %v1729_v38 = vunpack.i.h.bf16 %v1727_v3  ;;  %v1728_v39 = vunpack.i.l.bf16 %v1727_v3 }
  0xae   : > { %v1724_v29 = vunpack.i.h.bf16 %v2368_v4  ;;  %v1723_v30 = vunpack.i.l.bf16 %v2368_v4 }
  0xaf   : > { %v1263_v0 = vsel %vm1262_vm11, %v1254_v50, %v1728_v39  ;;  %v1264_v54 = vsel %vm1262_vm11, %v1255_v51, %v1729_v38  ;;  %v1185_v38 = vsel %vm422_vm0, %v2295_v25, %v1714_v24 }
  0xb0   : > { %v1737_v40 = vpop.permute.xlu1 %1736 }
  0xb1   : > { %v2372_v11 = vpop.permute.xlu0 %1731  ;;  %v1739_v42 = vunpack.i.h.bf16 %v1737_v40  ;;  %v1738_v43 = vunpack.i.l.bf16 %v1737_v40 }
  0xb2   : > { %v1734_v31 = vunpack.i.h.bf16 %v2372_v11 }
  0xb3   : > { %v1272_v59 = vsel %vm1271_vm12, %v1263_v0, %v1738_v43  ;;  %v1273_v60 = vsel %vm1271_vm12, %v1264_v54, %v1739_v42  ;;  %v1193_v42 = vsel %vm1190_vm3, %v1184_v61, %v1723_v30 }
  0xb4   : > { %v1747_v18 = vpop.permute.xlu1 %1746 }
  0xb5   : > { %v2376_v19 = vpop.permute.xlu0 %1741  ;;  %v1749_v46 = vunpack.i.h.bf16 %v1747_v18  ;;  %v1748_v47 = vunpack.i.l.bf16 %v1747_v18 }
  0xb6   : > { %v1744_v34 = vunpack.i.h.bf16 %v2376_v19  ;;  %v1743_v35 = vunpack.i.l.bf16 %v2376_v19 }
  0xb7   : > { %v1281_v62 = vsel %vm2592_vm13, %v1272_v59, %v1748_v47  ;;  %v1282_v63 = vsel %vm2592_vm13, %v1273_v60, %v1749_v46  ;;  %vm2410_vm13 = vmpackc.low %vm2593_vm2, %vm2593_vm2  ;;  %vm2597_vm2 = vcmask 392192  }
  0xb8   : > { %v1757_v32 = vpop.permute.xlu1 %1756 }
  0xb9   : > { %v2384_v33 = vpop.permute.xlu0 %1751  ;;  %v1759_v52 = vunpack.i.h.bf16 %v1757_v32  ;;  %v1758_v53 = vunpack.i.l.bf16 %v1757_v32  ;;  %v1733_v32 = vunpack.i.l.bf16 %v2372_v11  ;;  %v1194_v11 = vsel %vm1190_vm3, %v1185_v38, %v1724_v29 }
  0xba   : > { %v1754_v39 = vunpack.i.h.bf16 %v2384_v33  ;;  %v1753_v4 = vunpack.i.l.bf16 %v2384_v33  ;;  %v1203_v45 = vsel %vm1199_vm4, %v1194_v11, %v1734_v31 }
  0xbb   : > { %v1290_v3 = vsel %vm1289_vm14, %v1281_v62, %v1758_v53  ;;  %v1291_v5 = vsel %vm1289_vm14, %v1282_v63, %v1759_v52  ;;  %v1202_v44 = vsel %vm1199_vm4, %v1193_v42, %v1733_v32  ;;  %v1212_v47 = vsel %vm1208_vm5, %v1203_v45, %v1744_v34 }
  0xbc   : > { %v1767_v48 = vpop.permute.xlu1 %1766  ;;  %v1211_v41 = vsel %vm1208_vm5, %v1202_v44, %v1743_v35  ;;  %v1221_v53 = vsel %vm1217_vm6, %v1212_v47, %v1754_v39 }
  0xbd   : > { %v2392_v49 = vpop.permute.xlu0 %1761  ;;  %v1769_v57 = vunpack.i.h.bf16 %v1767_v48  ;;  %v1768_v58 = vunpack.i.l.bf16 %v1767_v48  ;;  %v1220_v52 = vsel %vm1217_vm6, %v1211_v41, %v1753_v4 }
  0xbe   : > { %v1764_v43 = vunpack.i.h.bf16 %v2392_v49  ;;  %v1763_v19 = vunpack.i.l.bf16 %v2392_v49 }
  0xbf   : > { %v1299_v8 = vsel %vm1298_vm15, %v1290_v3, %v1768_v58  ;;  %v1300_v9 = vsel %vm1298_vm15, %v1291_v5, %v1769_v57 }
  0xc0   : > { %v1777_v1 = vpop.permute.xlu1 %1776  ;;  %v1229_v54 = vsel %vm1226_vm7, %v1220_v52, %v1763_v19  ;;  %v1230_v57 = vsel %vm1226_vm7, %v1221_v53, %v1764_v43 }
  0xc1   : > { %v1772_v2 = vpop.permute.xlu0 %1771  ;;  %v1779_v6 = vunpack.i.h.bf16 %v1777_v1  ;;  %v1778_v7 = vunpack.i.l.bf16 %v1777_v1 }
  0xc2   : > { %v1774_v25 = vunpack.i.h.bf16 %v1772_v2  ;;  %v1773_v46 = vunpack.i.l.bf16 %v1772_v2 }
  0xc3   : > { %v1308_v10 = vsel %vm1307_vm1, %v1299_v8, %v1778_v7  ;;  %v1309_v40 = vsel %vm1307_vm1, %v1300_v9, %v1779_v6 }
  0xc4   : > { %v2414_v13 = vpop.permute.xlu1 %1786  ;;  %v1597_v15 = vpack.c.bf16 %v1309_v40, %v1308_v10  ;;  %v1238_v60 = vsel %vm1235_vm8, %v1229_v54, %v1773_v46  ;;  %v1239_v62 = vsel %vm1235_vm8, %v1230_v57, %v1774_v25 }
  0xc5   : > { %v1782_v14 = vpop.permute.xlu0 %1781  ;;  %v1789_v25 = vunpack.i.h.bf16 %v2414_v13  ;;  %v1788_v46 = vunpack.i.l.bf16 %v2414_v13 }
  0xc6   : > { %1599 = vmatpush3.bf16.xpose.msk.msra.mxu0 %vm2410_vm13, %v1597_v15  ;;  %v1784_v48 = vunpack.i.h.bf16 %v1782_v14  ;;  %v1783_v33 = vunpack.i.l.bf16 %v1782_v14 }
  0xc7   : > { %1600 = vmatprep.subr.bf16.mxu0 %v2016_v20  ;;  %v1186_v13 = vsel %vm422_vm0, %v2297_v26, %v1788_v46 }
  0xc8   : > { %v2419_v16 = vpop.permute.xlu1 %1796  ;;  %v1247_v2 = vsel %vm2594_vm9, %v1238_v60, %v1783_v33  ;;  %v1248_v3 = vsel %vm2594_vm9, %v1239_v62, %v1784_v48  ;;  %vm2598_vm9 = vmmov %vm2597_vm2 }
  0xc9   : > { %v1792_v17 = vpop.permute.xlu0 %1791  ;;  %v1799_v41 = vunpack.i.h.bf16 %v2419_v16  ;;  %v1798_v47 = vunpack.i.l.bf16 %v2419_v16 }
  0xca   : > { %v1794_v49 = vunpack.i.h.bf16 %v1792_v17  ;;  %v1793_v0 = vunpack.i.l.bf16 %v1792_v17 }
  0xcb   : > { %v1195_v57 = vsel %vm1190_vm3, %v1186_v13, %v1798_v47 }
  0xcc   : > { %v2421_v18 = vpop.permute.xlu1 %1806  ;;  %v1256_v9 = vsel %vm1253_vm10, %v1247_v2, %v1793_v0  ;;  %v1257_v10 = vsel %vm1253_vm10, %v1248_v3, %v1794_v49  ;;  %v1187_v0 = vsel %vm422_vm0, %v2321_v55, %v1789_v25 }
  0xcd   : > { %v1802_v21 = vpop.permute.xlu0 %1801  ;;  %v1809_v48 = vunpack.i.h.bf16 %v2421_v18  ;;  %v1808_v33 = vunpack.i.l.bf16 %v2421_v18  ;;  %v1196_v18 = vsel %vm1190_vm3, %v1187_v0, %v1799_v41 }
  0xce   : > { %v1804_v58 = vunpack.i.h.bf16 %v1802_v21  ;;  %v1803_v59 = vunpack.i.l.bf16 %v1802_v21 }
  0xcf   : > { %v1205_v60 = vsel %vm1199_vm4, %v1196_v18, %v1809_v48 }
  0xd0   : > { %v2423_v22 = vpop.permute.xlu1 %1816  ;;  %v1265_v15 = vsel %vm1262_vm11, %v1256_v9, %v1803_v59  ;;  %v1266_v17 = vsel %vm1262_vm11, %v1257_v10, %v1804_v58  ;;  %v1204_v59 = vsel %vm1199_vm4, %v1195_v57, %v1808_v33 }
  0xd1   : > { %v1812_v23 = vpop.permute.xlu0 %1811  ;;  %v1818_v52 = vunpack.i.l.bf16 %v2423_v22 }
  0xd2   : > { %v1814_v63 = vunpack.i.h.bf16 %v1812_v23  ;;  %v1813_v1 = vunpack.i.l.bf16 %v1812_v23 }
  0xd3   : > { %v1213_v62 = vsel %vm1208_vm5, %v1204_v59, %v1818_v52 }
  0xd4   : > { %v2433_v36 = vpop.permute.xlu1 %1826  ;;  %v1274_v24 = vsel %vm1271_vm12, %v1265_v15, %v1813_v1  ;;  %v1275_v28 = vsel %vm1271_vm12, %v1266_v17, %v1814_v63 }
  0xd5   : > { %v1822_v37 = vpop.permute.xlu0 %1821  ;;  %v1829_v54 = vunpack.i.h.bf16 %v2433_v36  ;;  %v1828_v16 = vunpack.i.l.bf16 %v2433_v36 }
  0xd6   : > { %v1824_v5 = vunpack.i.h.bf16 %v1822_v37  ;;  %v1823_v6 = vunpack.i.l.bf16 %v1822_v37 }
  0xd8   : > { %v2449_v50 = vpop.permute.xlu1 %1836  ;;  %v1283_v29 = vsel %vm2597_vm2, %v1274_v24, %v1823_v6  ;;  %v1284_v30 = vsel %vm2598_vm9, %v1275_v28, %v1824_v5  ;;  %v1222_v5 = vsel %vm1217_vm6, %v1213_v62, %v1828_v16  ;;  %vm2599_vm9 = vcmask 261120  }
  0xd9   : > { %v1832_v51 = vpop.permute.xlu0 %1831  ;;  %v1839_v58 = vunpack.i.h.bf16 %v2449_v50  ;;  %vm2600_vm2 = vmmov %vm2599_vm9 }
  0xda   : > { %v1834_v40 = vunpack.i.h.bf16 %v1832_v51  ;;  %v1833_v14 = vunpack.i.l.bf16 %v1832_v51  ;;  %v1819_v51 = vunpack.i.h.bf16 %v2423_v22  ;;  %v1838_v22 = vunpack.i.l.bf16 %v2449_v50 }
  0xdc   : > { %v2459_v7 = vpop.permute.xlu1 %1846  ;;  %v1292_v34 = vsel %vm1289_vm14, %v1283_v29, %v1833_v14  ;;  %v1293_v35 = vsel %vm1289_vm14, %v1284_v30, %v1834_v40  ;;  %v1214_v36 = vsel %vm1208_vm5, %v1205_v60, %v1819_v51  ;;  %v1231_v6 = vsel %vm1226_vm7, %v1222_v5, %v1838_v22 }
  0xdd   : > { %v1842_v8 = vpop.permute.xlu0 %1841  ;;  %v1849_v55 = vunpack.i.h.bf16 %v2459_v7  ;;  %v1848_v26 = vunpack.i.l.bf16 %v2459_v7  ;;  %v1223_v50 = vsel %vm1217_vm6, %v1214_v36, %v1829_v54 }
  0xde   : > { %v1844_v21 = vunpack.i.h.bf16 %v1842_v8  ;;  %v1843_v23 = vunpack.i.l.bf16 %v1842_v8  ;;  %v1232_v8 = vsel %vm1226_vm7, %v1223_v50, %v1839_v58 }
  0xdf   : > { %v1240_v7 = vsel %vm1235_vm8, %v1231_v6, %v1848_v26  ;;  %v1241_v40 = vsel %vm1235_vm8, %v1232_v8, %v1849_v55 }
  0xe0   : > { %v1857_v31 = vpop.permute.xlu1 %1856  ;;  %v1301_v61 = vsel %vm1298_vm15, %v1292_v34, %v1843_v23  ;;  %v1302_v39 = vsel %vm1298_vm15, %v1293_v35, %v1844_v21 }
  0xe1   : > { %v1852_v32 = vpop.permute.xlu0 %1851  ;;  %v1859_v63 = vunpack.i.h.bf16 %v1857_v31  ;;  %v1858_v1 = vunpack.i.l.bf16 %v1857_v31 }
  0xe2   : > { %v1854_v37 = vunpack.i.h.bf16 %v1852_v32  ;;  %v1853_v38 = vunpack.i.l.bf16 %v1852_v32 }
  0xe3   : > { %v1249_v17 = vsel %vm2599_vm9, %v1240_v7, %v1858_v1  ;;  %v1250_v21 = vsel %vm2600_vm2, %v1241_v40, %v1859_v63 }
  0xe4   : > { %v1310_v4 = vsel %vm1307_vm1, %v1301_v61, %v1853_v38  ;;  %v1311_v42 = vsel %vm1307_vm1, %v1302_v39, %v1854_v37  ;;  %v1867_v43 = vpop.permute.xlu1 %1866 }
  0xe5   : > { %v1601_v11 = vpack.c.bf16 %v1311_v42, %v1310_v4  ;;  %v1862_v19 = vpop.permute.xlu0 %1861  ;;  %v1869_v9 = vunpack.i.h.bf16 %v1867_v43  ;;  %v1868_v10 = vunpack.i.l.bf16 %v1867_v43 }
  0xe6   : > { %v1864_v14 = vunpack.i.h.bf16 %v1862_v19  ;;  %v1863_v15 = vunpack.i.l.bf16 %v1862_v19 }
  0xe7   : > { %1603 = vmatpush3.bf16.xpose.msk.msra.mxu0 %vm2410_vm13, %v1601_v11  ;;  %v1258_v35 = vsel %vm1253_vm10, %v1249_v17, %v1868_v10  ;;  %v1259_v37 = vsel %vm1253_vm10, %v1250_v21, %v1869_v9 }
  0xe8   : > { %1604 = vmatprep.subr.bf16.mxu0 %v2016_v20  ;;  %v1877_v44 = vpop.permute.xlu1 %1876  ;;  %v1189_v39 = vsel %vm422_vm0, %v2343_v27, %v1864_v14  ;;  %v1188_v4 = vsel %vm422_vm0, %v2323_v56, %v1863_v15  ;;  %vm2601_vm0 = vcmask 392192  }
  0xe9   : > { %v2478_v45 = vpop.permute.xlu0 %1871  ;;  %v1879_v23 = vunpack.i.h.bf16 %v1877_v44  ;;  %v1878_v24 = vunpack.i.l.bf16 %v1877_v44  ;;  %vm2602_vm9 = vmmov %vm2601_vm0 }
  0xea   : > { %v1874_v30 = vunpack.i.h.bf16 %v2478_v45  ;;  %v1873_v31 = vunpack.i.l.bf16 %v2478_v45 }
  0xeb   : > { %v1267_v43 = vsel %vm1262_vm11, %v1258_v35, %v1878_v24  ;;  %v1268_v19 = vsel %vm1262_vm11, %v1259_v37, %v1879_v23 }
  0xec   : > { %v1887_v53 = vpop.permute.xlu1 %1886  ;;  %v1197_v41 = vsel %vm1190_vm3, %v1188_v4, %v1873_v31  ;;  %v1198_v47 = vsel %vm1190_vm3, %v1189_v39, %v1874_v30  ;;  %vm2603_vm3 = vmmov %vm2600_vm2 }
  0xed   : > { %v1882_v49 = vpop.permute.xlu0 %1881  ;;  %v1889_v32 = vunpack.i.h.bf16 %v1887_v53  ;;  %v1888_v34 = vunpack.i.l.bf16 %v1887_v53 }
  0xee   : > { %v1884_v38 = vunpack.i.h.bf16 %v1882_v49  ;;  %v1883_v61 = vunpack.i.l.bf16 %v1882_v49 }
  0xef   : > { %v1276_v48 = vsel %vm1271_vm12, %v1267_v43, %v1888_v34  ;;  %v1277_v27 = vsel %vm1271_vm12, %v1268_v19, %v1889_v32 }
  0xf0   : > { %v1897_v2 = vpop.permute.xlu1 %1896  ;;  %v1206_v56 = vsel %vm1199_vm4, %v1197_v41, %v1883_v61  ;;  %v1207_v33 = vsel %vm1199_vm4, %v1198_v47, %v1884_v38  ;;  %vm2604_vm4 = vmmov %vm2600_vm2 }
  0xf1   : > { %v2504_v3 = vpop.permute.xlu0 %1891  ;;  %v1899_v42 = vunpack.i.h.bf16 %v1897_v2  ;;  %v1898_v11 = vunpack.i.l.bf16 %v1897_v2 }
  0xf2   : > { %v1894_v0 = vunpack.i.h.bf16 %v2504_v3  ;;  %v1893_v13 = vunpack.i.l.bf16 %v2504_v3 }
  0xf3   : > { %v1285_v53 = vsel %vm2601_vm0, %v1276_v48, %v1898_v11  ;;  %v1286_v49 = vsel %vm2602_vm9, %v1277_v27, %v1899_v42 }
  0xf4   : > { %v1907_v28 = vpop.permute.xlu1 %1906  ;;  %v1215_v2 = vsel %vm1208_vm5, %v1206_v56, %v1893_v13  ;;  %v1216_v3 = vsel %vm1208_vm5, %v1207_v33, %v1894_v0  ;;  %vm2605_vm5 = vmmov %vm2601_vm0 }
  0xf5   : > { %v1902_v29 = vpop.permute.xlu0 %1901  ;;  %v1909_v44 = vunpack.i.h.bf16 %v1907_v28  ;;  %v1908_v45 = vunpack.i.l.bf16 %v1907_v28 }
  0xf6   : > { %v1904_v57 = vunpack.i.h.bf16 %v1902_v29  ;;  %v1903_v18 = vunpack.i.l.bf16 %v1902_v29 }
  0xf7   : > { %v1294_v54 = vsel %vm1289_vm14, %v1285_v53, %v1908_v45  ;;  %v1295_v16 = vsel %vm1289_vm14, %v1286_v49, %v1909_v44 }
  0xf8   : > { %v1917_v25 = vpop.permute.xlu1 %1916  ;;  %v1224_v6 = vsel %vm1217_vm6, %v1215_v2, %v1903_v18  ;;  %v1225_v8 = vsel %vm1217_vm6, %v1216_v3, %v1904_v57  ;;  %vm2606_vm6 = vmmov %vm2601_vm0  ;;  %v1316_v18 = vld [vmem:[%s2590_s3] sm:$0xff] }
  0xf9   : > { %v1912_v46 = vpop.permute.xlu0 %1911  ;;  %v1919_v51 = vunpack.i.h.bf16 %v1917_v25  ;;  %v1918_v52 = vunpack.i.l.bf16 %v1917_v25 }
  0xfa   : > { %v1914_v59 = vunpack.i.h.bf16 %v1912_v46  ;;  %v1913_v60 = vunpack.i.l.bf16 %v1912_v46 }
  0xfb   : > { %v1303_v62 = vsel %vm1298_vm15, %v1294_v54, %v1918_v52  ;;  %v1304_v36 = vsel %vm1298_vm15, %v1295_v16, %v1919_v51 }
  0xfc   : > { %v1927_v58 = vpop.permute.xlu1 %1926  ;;  %v1233_v40 = vsel %vm1226_vm7, %v1224_v6, %v1913_v60  ;;  %v1234_v14 = vsel %vm1226_vm7, %v1225_v8, %v1914_v59  ;;  %vm2607_vm7 = vcmask 523264  }
  0xfd   : > { %v1922_v22 = vpop.permute.xlu0 %1921  ;;  %v1929_v55 = vunpack.i.h.bf16 %v1927_v58  ;;  %v1928_v26 = vunpack.i.l.bf16 %v1927_v58 }
  0xfe   : > { %v1924_v63 = vunpack.i.h.bf16 %v1922_v22  ;;  %v1923_v1 = vunpack.i.l.bf16 %v1922_v22 }
  0xff   : > { %v1312_v5 = vsel %vm1307_vm1, %v1303_v62, %v1928_v26  ;;  %v1313_v50 = vsel %vm1307_vm1, %v1304_v36, %v1929_v55 }
 0x100   : > { %v1605_v9 = vpack.c.bf16 %v1313_v50, %v1312_v5  ;;  %v1937_v7 = vpop.permute.xlu1 %1936  ;;  %v1242_v21 = vsel %vm1235_vm8, %v1233_v40, %v1923_v1  ;;  %v1243_v23 = vsel %vm1235_vm8, %v1234_v14, %v1924_v63  ;;  %vm2608_vm8 = vmmov %vm2607_vm7 }
 0x101   : > { %v1932_v10 = vpop.permute.xlu0 %1931  ;;  %v1939_v24 = vunpack.i.h.bf16 %v1937_v7  ;;  %v1938_v28 = vunpack.i.l.bf16 %v1937_v7 }
 0x102   : > { %v1934_v15 = vunpack.i.h.bf16 %v1932_v10  ;;  %v1933_v17 = vunpack.i.l.bf16 %v1932_v10  ;;  %1607 = vmatpush3.bf16.xpose.msk.msra.mxu0 %vm2410_vm13, %v1605_v9 }
 0x103   : > { %1608 = vmatprep.subr.bf16.mxu0 %v2016_v20 }
 0x104   : > { %v1251_v29 = vsel %vm2603_vm3, %v1242_v21, %v1933_v17  ;;  %v1252_v30 = vsel %vm2604_vm4, %v1243_v23, %v1934_v15  ;;  %v1947_v32 = vpop.permute.xlu1 %1946 }
 0x105   : > { %v1942_v31 = vpop.permute.xlu0 %1941  ;;  %v1260_v37 = vsel %vm1253_vm10, %v1251_v29, %v1938_v28  ;;  %v1261_v38 = vsel %vm1253_vm10, %v1252_v30, %v1939_v24  ;;  %v1949_v61 = vunpack.i.h.bf16 %v1947_v32  ;;  %v1948_v39 = vunpack.i.l.bf16 %v1947_v32 }
 0x106   : > { %v1944_v34 = vunpack.i.h.bf16 %v1942_v31  ;;  %v1943_v35 = vunpack.i.l.bf16 %v1942_v31 }
 0x108   : > { %v1269_v4 = vsel %vm1262_vm11, %v1260_v37, %v1943_v35  ;;  %v1270_v42 = vsel %vm1262_vm11, %v1261_v38, %v1944_v34  ;;  %v1957_v43 = vpop.permute.xlu1 %1956 }
 0x109   : > { %v1952_v11 = vpop.permute.xlu0 %1951  ;;  %v1278_v20 = vsel %vm1271_vm12, %v1269_v4, %v1948_v39  ;;  %v1279_v45 = vsel %vm1271_vm12, %v1270_v42, %v1949_v61  ;;  %v1959_v25 = vunpack.i.h.bf16 %v1957_v43  ;;  %v1958_v46 = vunpack.i.l.bf16 %v1957_v43 }
 0x10a   : > { %v1954_v19 = vunpack.i.h.bf16 %v1952_v11  ;;  %v1953_v44 = vunpack.i.l.bf16 %v1952_v11 }
 0x10c   : > { %v1287_v41 = vsel %vm2605_vm5, %v1278_v20, %v1953_v44  ;;  %v1288_v47 = vsel %vm2606_vm6, %v1279_v45, %v1954_v19  ;;  %v1967_v27 = vpop.permute.xlu1 %1966 }
 0x10d   : > { %v1962_v48 = vpop.permute.xlu0 %1961  ;;  %v1969_v51 = vunpack.i.h.bf16 %v1967_v27  ;;  %v1968_v52 = vunpack.i.l.bf16 %v1967_v27  ;;  %v1296_v53 = vsel %vm1289_vm14, %v1287_v41, %v1958_v46  ;;  %v1297_v49 = vsel %vm1289_vm14, %v1288_v47, %v1959_v25 }
 0x10e   : > { %v1964_v56 = vunpack.i.h.bf16 %v1962_v48  ;;  %v1963_v33 = vunpack.i.l.bf16 %v1962_v48 }
 0x110   : > { %v1305_v0 = vsel %vm1298_vm15, %v1296_v53, %v1963_v33  ;;  %v1306_v13 = vsel %vm1298_vm15, %v1297_v49, %v1964_v56 }
 0x111   : > { %v1314_v54 = vsel %vm1307_vm1, %v1305_v0, %v1968_v52  ;;  %v1315_v16 = vsel %vm1307_vm1, %v1306_v13, %v1969_v51 }
 0x112   : > { %v1609_v57 = vpack.c.bf16 %v1315_v16, %v1314_v54 }
 0x114   : > { %1611 = vmatpush3.bf16.xpose.msk.msra.mxu0 %vm2410_vm13, %v1609_v57 }
 0x11b   : > { %1594 = vmatmul.mubr.msk.f32.vlgmr.msra.gmra.mrb[0].mxu0 %vm2607_vm7, %v1316_v18 }
 0x1ee   : > { %v1411_v58 = vpop.f32.mrb[0].mxu0 }
 0x1ef   : > { %1415 = vst.msk [vmem:[%s388_s2] sm:$0xff] %vm2608_vm8, %v1411_v58  ;;  %v1595_v22 = vpop.f32.mrb[1].mxu0 }
 0x1f0 PF: > { %s14_s17 = sadd.s32 1, %s2000_s17   ;;  %s2609_s15 = smov %s1996_s16 }
 0x1f1   : > { %p11_p6 = scmp.ge.s32.totalorder %s14_s17, 4   ;;  %s2610_s16 = smov %s2612_s1 }
 0x1f3   :  { %13 = sbr.rel (!%p11_p6) target bundleno = 2 (0x2), region = 186 }

</bundles_post_ra>
